<compile_context>
chip_gen: v7x
topology: tpu7x:2x2x1
jax: 0.10.0
libtpu: 0.0.40
codegen_flags: <defaults>
</compile_context>

<pallas_src>
import functools

import jax
import jax.numpy as jnp
from jax.experimental import pallas as pl
from jax.experimental.pallas import tpu as pltpu


def _round_up(x, m):
    return ((x + m - 1) // m) * m


# ----------------------------------------------------------------------------
# Encoder kernel: fused conv1d(k=3,pad=1) matmul + ReLU + MaxPool(L) + LayerNorm
# Input is im2col'd in the wrapper, so the conv is ONE (TB*L, 3C) x (3C, H) dot.
# ----------------------------------------------------------------------------
def _encoder_kernel(x_ref, w_ref, b_ref, gamma_ref, beta_ref, o_ref, *, eps, L, tb):
    x = x_ref[...]                                        # (tb*L, 3*C_in)
    w = w_ref[...]                                        # (3*C_in, H)

    # Single MXU push, bf16 inputs, f32 accumulation.
    y = jnp.dot(x.astype(jnp.bfloat16), w.astype(jnp.bfloat16),
                preferred_element_type=jnp.float32)       # (tb*L, H)
    y = jnp.maximum(y + b_ref[...], 0.0)                  # conv bias + ReLU

    H = y.shape[-1]
    pooled = jnp.max(y.reshape(tb, L, H), axis=1)         # (tb, H)  MaxPool1d(L)

    # LayerNorm over H (fp32 elementwise; v5e-safe).
    mean = jnp.mean(pooled, axis=-1, keepdims=True)
    cent = pooled - mean
    var = jnp.mean(cent * cent, axis=-1, keepdims=True)
    normed = cent * jax.lax.rsqrt(var + eps)
    o_ref[...] = normed * gamma_ref[...] + beta_ref[...]


def encode_sentences(x3, w_flat, conv_b, gamma, beta, *, eps=1e-5, tb_max=128):
    """x3: (n_sent, L, 3*C_in) im2col'd embeddings -> (n_sent, H)."""
    n_sent, L, Cw = x3.shape
    H = w_flat.shape[-1]

    # Tile = multiple of 8 sentences; keep >=2 grid steps when possible so the
    # "parallel" axis can be sharded across TensorCores (v7x megacore).
    tb = min(tb_max, max(8, _round_up(pl.cdiv(n_sent, 2), 8)))
    n_pad = _round_up(n_sent, tb)
    if n_pad != n_sent:
        x3 = jnp.pad(x3, ((0, n_pad - n_sent), (0, 0), (0, 0)))
    x2 = x3.reshape(n_pad * L, Cw)                        # lane-dense 2D input

    kernel = functools.partial(_encoder_kernel, eps=eps, L=L, tb=tb)
    out = pl.pallas_call(
        kernel,
        out_shape=jax.ShapeDtypeStruct((n_pad, H), jnp.float32),
        grid=(n_pad // tb,),
        in_specs=[
            pl.BlockSpec((tb * L, Cw), lambda i: (i, 0)),
            pl.BlockSpec((Cw, H), lambda i: (0, 0)),
            pl.BlockSpec((1, H), lambda i: (0, 0)),
            pl.BlockSpec((1, H), lambda i: (0, 0)),
            pl.BlockSpec((1, H), lambda i: (0, 0)),
        ],
        out_specs=pl.BlockSpec((tb, H), lambda i: (i, 0)),
        compiler_params=pltpu.CompilerParams(
            dimension_semantics=("parallel",)),
    )(x2, w_flat, conv_b, gamma, beta)
    return out[:n_sent]


# ----------------------------------------------------------------------------
# Prototype rectification + logits kernel — whole batch in one invocation.
# Squared distances are computed on the MXU via  -|q-m|^2 = 2 q.m - |q|^2 - |m|^2.
# ----------------------------------------------------------------------------
def _proto_kernel(s_ref, q_ref, o_ref, *, N, K):
    S = s_ref[...]                                        # (B, N, K, H)
    Q = q_ref[...]                                        # (B, Qt, H)
    B, Qt, H = Q.shape
    LANE = o_ref.shape[-1]

    M = jnp.mean(S, axis=2)                               # (B, N, H) mean_support

    q_sq = jnp.sum(Q * Q, axis=-1, keepdims=True)         # (B, Qt, 1)
    m_sq = jnp.sum(M * M, axis=-1)[:, None, :]            # (B, 1, N)
    QM = jnp.einsum('bqh,bnh->bqn', Q, M,
                    preferred_element_type=jnp.float32)   # (B, Qt, N)  MXU
    Xq = 2.0 * QM - q_sq - m_sq                           # = -|q - m|^2

    # Cq = argmax over N (first occurrence), as a one-hot mask.
    iota_n = jax.lax.broadcasted_iota(jnp.int32, (B, Qt, N), 2)
    max_x = jnp.max(Xq, axis=-1, keepdims=True)
    Cq = jnp.min(jnp.where(Xq == max_x, iota_n, N), axis=-1, keepdims=True)
    mask = (iota_n == Cq).astype(jnp.float32)             # (B, Qt, N)

    # Xp @ M: support slots and (scatter-assigned) query slots.
    dot_S = jnp.sum(S * M[:, :, None, :], axis=-1)        # (B, N, K)
    dot_Q = QM * mask                                     # (B, Qt, N); 0 if unassigned

    # Softmax over the N (prototype) axis, per slot.
    def softmax_over(v, axis):
        m = jnp.max(v, axis=axis, keepdims=True)
        e = jnp.exp(v - m)
        return e * pl.reciprocal(jnp.sum(e, axis=axis, keepdims=True), approx=True)

    w_S = softmax_over(dot_S, 1)                          # (B, N, K)
    w_Q = softmax_over(dot_Q, 2)                          # (B, Qt, N)

    # (M_cos * Xp).sum(-2) / Xp_size   (unassigned query slots contribute 0)
    num = (jnp.sum(w_S[..., None] * S, axis=2)
           + jnp.einsum('bqn,bqh->bnh', w_Q * mask, Q,
                        preferred_element_type=jnp.float32))      # (B, N, H)
    sizes = jnp.float32(K) + jnp.sum(mask, axis=1)[..., None]     # (B, N, 1)
    proto = num / sizes                                           # (B, N, H)

    # logits = -|q - proto|^2, again via MXU identity.
    p_sq = jnp.sum(proto * proto, axis=-1)[:, None, :]            # (B, 1, N)
    QP = jnp.einsum('bqh,bnh->bqn', Q, proto,
                    preferred_element_type=jnp.float32)           # (B, Qt, N)
    logits = 2.0 * QP - q_sq - p_sq                               # (B, Qt, N)

    minn = jnp.min(logits, axis=-1, keepdims=True)                # (B, Qt, 1)
    na_col = minn - 1.0
    fill = jnp.broadcast_to(na_col, (B, Qt, LANE - N - 1))        # lane padding
    o_ref[...] = jnp.concatenate([logits, na_col, fill], axis=-1)  # (B, Qt, 128)


def proto_rectify_logits(support, query, *, N, K, lane=128):
    """support: (B, N, K, H), query: (B, Qt, H) -> logits (B, Qt, N+1)."""
    B, _, _, H = support.shape
    Qt = query.shape[1]
    kernel = functools.partial(_proto_kernel, N=N, K=K)
    out = pl.pallas_call(
        kernel,
        out_shape=jax.ShapeDtypeStruct((B, Qt, lane), jnp.float32),
    )(support, query)
    return out[:, :, :N + 1]


# ----------------------------------------------------------------------------
# Embedding + im2col glue (word + pos1 + pos2 lookup, window unfold) — plain JAX
# ----------------------------------------------------------------------------
def embed(words, pos1, pos2, word_mat, pos1_mat, pos2_mat):
    w = jnp.take(word_mat, words, axis=0)      # (n_sent, L, WD)
    p1 = jnp.take(pos1_mat, pos1, axis=0)      # (n_sent, L, PD)
    p2 = jnp.take(pos2_mat, pos2, axis=0)      # (n_sent, L, PD)
    return jnp.concatenate([w, p1, p2], axis=-1).astype(jnp.float32)


def im2col3(x):
    """(n, L, C) -> (n, L, 3C): window [t-1, t, t+1] with zero padding."""
    n, L, C = x.shape
    xp = jnp.pad(x, ((0, 0), (1, 1), (0, 0)))
    return jnp.concatenate([xp[:, 0:L], xp[:, 1:L + 1], xp[:, 2:L + 2]], axis=-1)


# ----------------------------------------------------------------------------
# Full PR.forward
# ----------------------------------------------------------------------------
def pr_forward(support_in, query_in, params, *, N, K, Q, na_rate):
    sup_emb = embed(support_in["word"], support_in["pos1"], support_in["pos2"],
                    params["word_mat"], params["pos1_mat"], params["pos2_mat"])
    qry_emb = embed(query_in["word"], query_in["pos1"], query_in["pos2"],
                    params["word_mat"], params["pos1_mat"], params["pos2_mat"])
    n_sup = sup_emb.shape[0]

    # Encode support + query sentences in a single pallas_call.
    x3 = im2col3(jnp.concatenate([sup_emb, qry_emb], axis=0))

    k3, c_in, H = params["conv_w"].shape
    w_flat = params["conv_w"].reshape(k3 * c_in, H)       # fused (3*C_in, H) weight

    vecs = encode_sentences(x3, w_flat, params["conv_b"],
                            params["ln_gamma"], params["ln_beta"])
    sup_vec = vecs[:n_sup]
    qry_vec = vecs[n_sup:]

    Qt = N * Q + na_rate * Q
    B = n_sup // (N * K)
    support = sup_vec.reshape(B, N, K, H)
    query = qry_vec.reshape(B, Qt, H)

    logits = proto_rectify_logits(support, query, N=N, K=K)   # (B, Qt, N+1)
    pred = jnp.argmax(logits.reshape(-1, N + 1), axis=1)      # (B*Qt,)
    return logits, pred, 0


# ----------------------------------------------------------------------------
if __name__ == "__main__":
    key = jax.random.PRNGKey(0)

    # Episode / encoder configuration (small, consistent with the module)
    B, N, K, Q, NA = 2, 4, 2, 2, 1
    L = 16                     # max_length
    WD, PD = 50, 5             # word / position embedding dims
    H = 128                    # hidden_size (lane-aligned; module default is 100)
    V = 20                     # vocab size
    Qt = N * Q + NA * Q

    ks = jax.random.split(key, 12)
    params = {
        "word_mat": jax.random.normal(ks[0], (V + 2, WD), jnp.float32) * 0.1,
        "pos1_mat": jax.random.normal(ks[1], (2 * L, PD), jnp.float32) * 0.1,
        "pos2_mat": jax.random.normal(ks[2], (2 * L, PD), jnp.float32) * 0.1,
        "conv_w":  jax.random.normal(ks[3], (3, WD + 2 * PD, H), jnp.float32) * 0.05,
        "conv_b":  jnp.zeros((1, H), jnp.float32),
        "ln_gamma": jnp.ones((1, H), jnp.float32),   # nn.LayerNorm default init
        "ln_beta":  jnp.zeros((1, H), jnp.float32),
    }

    n_sup, n_qry = B * N * K, B * Qt
    support_in = {
        "word": jax.random.randint(ks[4], (n_sup, L), 0, V),
        "pos1": jax.random.randint(ks[5], (n_sup, L), 0, 2 * L),
        "pos2": jax.random.randint(ks[6], (n_sup, L), 0, 2 * L),
    }
    query_in = {
        "word": jax.random.randint(ks[7], (n_qry, L), 0, V),
        "pos1": jax.random.randint(ks[8], (n_qry, L), 0, 2 * L),
        "pos2": jax.random.randint(ks[9], (n_qry, L), 0, 2 * L),
    }

    logits, pred, _ = pr_forward(support_in, query_in, params,
                                 N=N, K=K, Q=Q, na_rate=NA)
    jax.block_until_ready(logits)
    jax.block_until_ready(pred)

    assert logits.shape == (B, Qt, N + 1), logits.shape
    assert pred.shape == (B * Qt,), pred.shape
    assert bool(jnp.all(jnp.isfinite(logits)))
    print("KERNEL_OK")
</pallas_src>

<mosaic_0001>
module attributes {stable_mosaic.version = 11 : i64} {
  func.func @_encoder_kernel(%arg0: i32, %arg1: memref<384x180xf32, #tpu.memory_space<vmem>>, %arg2: memref<180x128xf32, #tpu.memory_space<vmem>>, %arg3: memref<1x128xf32, #tpu.memory_space<vmem>>, %arg4: memref<1x128xf32, #tpu.memory_space<vmem>>, %arg5: memref<1x128xf32, #tpu.memory_space<vmem>>, %arg6: memref<24x128xf32, #tpu.memory_space<vmem>>) attributes {dimension_semantics = [#tpu.dimension_semantics<parallel>], iteration_bounds = array<i64: 2>, scalar_prefetch = 0 : i64, scratch_operands = 0 : i64, tpu.core_type = #tpu.core_type<tc>, window_params = [{transform_indices = @transform_0, window_bounds = array<i64: 384, 180>}, {pipeline_mode = #tpu.pipeline_mode<synchronous>, transform_indices = @transform_1, window_bounds = array<i64: 180, 128>}, {pipeline_mode = #tpu.pipeline_mode<synchronous>, transform_indices = @transform_2, window_bounds = array<i64: 1, 128>}, {pipeline_mode = #tpu.pipeline_mode<synchronous>, transform_indices = @transform_3, window_bounds = array<i64: 1, 128>}, {pipeline_mode = #tpu.pipeline_mode<synchronous>, transform_indices = @transform_4, window_bounds = array<i64: 1, 128>}, {transform_indices = @transform_5, window_bounds = array<i64: 24, 128>}]} {
    %c0 = arith.constant 0 : index
    %c0_0 = arith.constant 0 : index
    %0 = vector.load %arg1[%c0, %c0_0] : memref<384x180xf32, #tpu.memory_space<vmem>>, vector<384x180xf32>
    %c0_1 = arith.constant 0 : index
    %c0_2 = arith.constant 0 : index
    %1 = vector.load %arg2[%c0_1, %c0_2] : memref<180x128xf32, #tpu.memory_space<vmem>>, vector<180x128xf32>
    %2 = arith.truncf %0 : vector<384x180xf32> to vector<384x180xbf16>
    %3 = arith.truncf %1 : vector<180x128xf32> to vector<180x128xbf16>
    %cst = arith.constant dense<0.000000e+00> : vector<384x128xf32>
    %4 = tpu.matmul %2, %3, %cst {dimension_numbers = #tpu.dot_dimension_numbers<[1], [0], [0], [1], [0, 0, 1, 1], [], []>} : vector<384x180xbf16>, vector<180x128xbf16>, vector<384x128xf32> -> vector<384x128xf32>
    %c0_3 = arith.constant 0 : index
    %c0_4 = arith.constant 0 : index
    %5 = vector.load %arg3[%c0_3, %c0_4] : memref<1x128xf32, #tpu.memory_space<vmem>>, vector<1x128xf32>
    %6 = vector.broadcast %5 : vector<1x128xf32> to vector<384x128xf32>
    %7 = arith.addf %4, %6 : vector<384x128xf32>
    %cst_5 = arith.constant 0.000000e+00 : f32
    %8 = vector.broadcast %cst_5 : f32 to vector<384x128xf32>
    %9 = arith.maximumf %7, %8 : vector<384x128xf32>
    %10 = vector.shape_cast %9 : vector<384x128xf32> to vector<24x16x128xf32>
    %cst_6 = arith.constant dense<0xFF800000> : vector<24x128xf32>
    %11 = vector.multi_reduction <maximumf>, %10, %cst_6 [1] : vector<24x16x128xf32> to vector<24x128xf32>
    %cst_7 = arith.constant dense<0.000000e+00> : vector<24xf32>
    %12 = vector.multi_reduction <add>, %11, %cst_7 [1] : vector<24x128xf32> to vector<24xf32>
    %13 = vector.shape_cast %12 : vector<24xf32> to vector<24x1xf32>
    %cst_8 = arith.constant 1.280000e+02 : f32
    %14 = vector.broadcast %cst_8 : f32 to vector<24x1xf32>
    %15 = arith.divf %13, %14 : vector<24x1xf32>
    %16 = vector.broadcast %15 : vector<24x1xf32> to vector<24x128xf32>
    %17 = arith.subf %11, %16 : vector<24x128xf32>
    %18 = arith.mulf %17, %17 : vector<24x128xf32>
    %cst_9 = arith.constant dense<0.000000e+00> : vector<24xf32>
    %19 = vector.multi_reduction <add>, %18, %cst_9 [1] : vector<24x128xf32> to vector<24xf32>
    %20 = vector.shape_cast %19 : vector<24xf32> to vector<24x1xf32>
    %cst_10 = arith.constant 1.280000e+02 : f32
    %21 = vector.broadcast %cst_10 : f32 to vector<24x1xf32>
    %22 = arith.divf %20, %21 : vector<24x1xf32>
    %cst_11 = arith.constant 9.99999974E-6 : f32
    %23 = vector.broadcast %cst_11 : f32 to vector<24x1xf32>
    %24 = arith.addf %22, %23 : vector<24x1xf32>
    %25 = math.rsqrt %24 : vector<24x1xf32>
    %26 = vector.broadcast %25 : vector<24x1xf32> to vector<24x128xf32>
    %27 = arith.mulf %17, %26 : vector<24x128xf32>
    %c0_12 = arith.constant 0 : index
    %c0_13 = arith.constant 0 : index
    %28 = vector.load %arg4[%c0_12, %c0_13] : memref<1x128xf32, #tpu.memory_space<vmem>>, vector<1x128xf32>
    %29 = vector.broadcast %28 : vector<1x128xf32> to vector<24x128xf32>
    %30 = arith.mulf %27, %29 : vector<24x128xf32>
    %c0_14 = arith.constant 0 : index
    %c0_15 = arith.constant 0 : index
    %31 = vector.load %arg5[%c0_14, %c0_15] : memref<1x128xf32, #tpu.memory_space<vmem>>, vector<1x128xf32>
    %32 = vector.broadcast %31 : vector<1x128xf32> to vector<24x128xf32>
    %33 = arith.addf %30, %32 : vector<24x128xf32>
    %c0_16 = arith.constant 0 : index
    %c0_17 = arith.constant 0 : index
    %34 = vector.load %arg6[%c0_16, %c0_17] : memref<24x128xf32, #tpu.memory_space<vmem>>, vector<24x128xf32>
    tpu.vector_store %arg6[%c0_16, %c0_17], %33 {strides = array<i32>} : memref<24x128xf32, #tpu.memory_space<vmem>>, vector<24x128xf32>,
    return
  }
  func.func @transform_0(%arg0: i32) -> (i32, i32) {
    %c0_i32 = arith.constant 0 : i32
    %c0_i32_0 = arith.constant 0 : i32
    return %arg0, %c0_i32 : i32, i32
  }
  func.func @transform_1(%arg0: i32) -> (i32, i32) {
    %c0_i32 = arith.constant 0 : i32
    %c0_i32_0 = arith.constant 0 : i32
    %c0_i32_1 = arith.constant 0 : i32
    return %c0_i32, %c0_i32_0 : i32, i32
  }
  func.func @transform_2(%arg0: i32) -> (i32, i32) {
    %c0_i32 = arith.constant 0 : i32
    %c0_i32_0 = arith.constant 0 : i32
    %c0_i32_1 = arith.constant 0 : i32
    return %c0_i32, %c0_i32_0 : i32, i32
  }
  func.func @transform_3(%arg0: i32) -> (i32, i32) {
    %c0_i32 = arith.constant 0 : i32
    %c0_i32_0 = arith.constant 0 : i32
    %c0_i32_1 = arith.constant 0 : i32
    return %c0_i32, %c0_i32_0 : i32, i32
  }
  func.func @transform_4(%arg0: i32) -> (i32, i32) {
    %c0_i32 = arith.constant 0 : i32
    %c0_i32_0 = arith.constant 0 : i32
    %c0_i32_1 = arith.constant 0 : i32
    return %c0_i32, %c0_i32_0 : i32, i32
  }
  func.func @transform_5(%arg0: i32) -> (i32, i32) {
    %c0_i32 = arith.constant 0 : i32
    %c0_i32_0 = arith.constant 0 : i32
    return %arg0, %c0_i32 : i32, i32
  }
}

</mosaic_0001>

<bundles_post_ra>
// kernel: tpu_custom_call.1
= control target key start
LH: loop header
LB: loop body
LE: loop exit
PB: predicated region body
PF: predicated region fallthrough
CT: control target
= control target key end

     0   :  { %10 = vsyncpa [#allocation3], 0  ;;  %s2463_s0 = inlined_call_operand.vmem [shape: f32[768,180], index: 0, kind: input, shape index: {}]   ;;  %s2464_s1 = inlined_call_operand.vmem [shape: f32[180,128], index: 1, kind: input, shape index: {}]   ;;  %s2465_s2 = inlined_call_operand.vmem [shape: f32[1,128], index: 2, kind: input, shape index: {}]   ;;  %s2466_s3 = inlined_call_operand.vmem [shape: f32[1,128], index: 3, kind: input, shape index: {}]   ;;  %s2467_s4 = inlined_call_operand.vmem [shape: f32[1,128], index: 4, kind: input, shape index: {}]   ;;  %s2468_s5 = inlined_call_operand.hbm [shape: f32[48,128], index: 5, kind: output, shape index: {}]  }
   0x1   :  { %12 = vsyncpa [#allocation3 + $0x1], 0  ;;  %s1670_s18 = smov 0   ;;  %s1672_s19 = smov 0  }
   0x2   :  { %s1674_s20 = smov 0   ;;  %s1676_s21 = smov 0  }
   0x3 LB: > { %s1691_s22 = sadd.s32 4294967295, %s1634_s21   ;;  %s1461_s23 = sadd.s32 4294967294, %s1634_s21   ;;  %s1634_s21 = sphi %s1676_s21, %s2474_s21   ;;  %s1630_s20 = sphi %s1674_s20, %s2473_s20   ;;  %s1626_s19 = sphi %s1672_s19, %s2472_s19   ;;  %s1622_s18 = sphi %s1670_s18, %s2471_s18  }
   0x4   : > { %s1695_s24 = sadd.s32 1, %s1634_s21   ;;  %s135_s25 = sadd.s32 1, %s1630_s20 }
   0x5   : > { %s132_s26 = ssub.s32 %s1634_s21, %s1695_s24  ;;  %p145_p0 = scmp.ne.s32.totalorder %s1630_s20, %s1626_s19 }
   0x6   : > { %p133_p1 = scmp.eq.s32.totalorder %s132_s26, 0  ;;  %p146_p2 = scmp.eq.s32.totalorder %s1691_s22, 1 }
   0x7   : > { %p151_p3 = scmp.ne.s32.totalorder %s1626_s19, %s1622_s18  ;;  %p152_p4 = scmp.eq.s32.totalorder %s1461_s23, 1 }
   0x8   : > { %s1706_s27 = scalar_select %p133_p1, %s1630_s20, %s135_s25  }
   0x9   : > { %p1708_p5 = por %p146_p2, %p145_p0  ;;  %p1712_p6 = por %p152_p4, %p151_p3 }
   0xa   : > { %p1464_p7 = scmp.ge.s32.totalorder %s1634_s21, 1  ;;  %p192_p8 = scmp.lt.s32.totalorder %s1634_s21, 3 }
   0xc   : > { %p193_p9 = pnand %p1464_p7, %p192_p8 }
   0xd   : > { %v326_v0 = vld [vmem:[%s2464_s1] sm:$0xff] (!%p193_p9)  ;;  %v327_v1 = vld [vmem:[%s2464_s1 + $0x8] sm:$0xff] (!%p193_p9)  ;;  %v328_v2 = vld [vmem:[%s2464_s1 + $0x10] sm:$0xff] (!%p193_p9)  ;;  %s221_s11 = smul.u32 (!%p193_p9), 48, %s1691_s22  ;;  %v1636_v3 = vmov (!%p193_p9), 0   ;;  %vm416_vm0 = vcmask (!%p193_p9), 424960  }
   0xe   : > { %196 = sbr.rel (%p193_p9) target bundleno = 741 (0x2e5), region = 40  ;;  %493 = vmatprep.subr.bf16.mxu0 (!%p193_p9), %v1636_v3  ;;  %1499 = vmatprep.subr.bf16.mxu1 (!%p193_p9), %v1636_v3  ;;  %v397_v4 = vpack.c.bf16 (!%p193_p9), %v327_v1, %v326_v0  ;;  %v329_v5 = vld [vmem:[%s2464_s1 + $0x18] sm:$0xff] (!%p193_p9)  ;;  %v330_v7 = vld [vmem:[%s2464_s1 + $0x20] sm:$0xff] (!%p193_p9)  ;;  %v331_v8 = vld [vmem:[%s2464_s1 + $0x28] sm:$0xff] (!%p193_p9)  ;;  %vm489_vm1 = vcmask (!%p193_p9), 1041408   ;;  %vm958_vm2 = vcmask (!%p193_p9), 1041409  }
   0xf   : > { %p222_p10 = scmp.lt.s32.totalorder (!%p193_p9), %s221_s11, 95  ;;  %v398_v6 = vpack.c.bf16 (!%p193_p9), %v329_v5, %v328_v2  ;;  %v399_v9 = vpack.c.bf16 (!%p193_p9), %v331_v8, %v330_v7  ;;  %v332_v10 = vld [vmem:[%s2464_s1 + $0x30] sm:$0xff] (!%p193_p9)  ;;  %v333_v11 = vld [vmem:[%s2464_s1 + $0x38] sm:$0xff] (!%p193_p9)  ;;  %v334_v19 = vld [vmem:[%s2464_s1 + $0x40] sm:$0xff] (!%p193_p9)  ;;  %vm960_vm3 = vcmask (!%p193_p9), 1042434   ;;  %vm962_vm4 = vcmask (!%p193_p9), 1043459  }
  0x10   : > { %494 = vmatpush1.bf16.msra.mxu0 (!%p193_p9), %v397_v4  ;;  %1511 = vmatpush1.bf16.msra.mxu1 (!%p193_p9), %v397_v4  ;;  %v400_v18 = vpack.c.bf16 (!%p193_p9), %v333_v11, %v332_v10  ;;  %v335_v20 = vld [vmem:[%s2464_s1 + $0x48] sm:$0xff] (!%p193_p9)  ;;  %v336_v22 = vld [vmem:[%s2464_s1 + $0x50] sm:$0xff] (!%p193_p9)  ;;  %v337_v23 = vld [vmem:[%s2464_s1 + $0x58] sm:$0xff] (!%p193_p9)  ;;  %vm964_vm5 = vcmask (!%p193_p9), 1044484   ;;  %vm966_vm6 = vcmask (!%p193_p9), 1045509   ;;  %vm968_vm7 = vcmask (!%p193_p9), 1046534  }
  0x11   : > { %495 = vmatprep.subr.bf16.mxu0 (!%p193_p9), %v1636_v3  ;;  %1500 = vmatprep.subr.bf16.mxu1 (!%p193_p9), %v1636_v3  ;;  %v401_v21 = vpack.c.bf16 (!%p193_p9), %v335_v20, %v334_v19  ;;  %v402_v24 = vpack.c.bf16 (!%p193_p9), %v337_v23, %v336_v22  ;;  %v338_v25 = vld [vmem:[%s2464_s1 + $0x60] sm:$0xff] (!%p193_p9)  ;;  %v339_v26 = vld [vmem:[%s2464_s1 + $0x68] sm:$0xff] (!%p193_p9)  ;;  %v340_v28 = vld [vmem:[%s2464_s1 + $0x70] sm:$0xff] (!%p193_p9)  ;;  %vm970_vm8 = vcmask (!%p193_p9), 1047559   ;;  %s218_s15 = sand.u32 (!%p193_p9), 1, %s1626_s19   ;;  %s1637_s8 = smov (!%p193_p9), [#allocation2]  }
  0x12   : > { %v403_v27 = vpack.c.bf16 (!%p193_p9), %v339_v26, %v338_v25  ;;  %v341_v29 = vld [vmem:[%s2464_s1 + $0x78] sm:$0xff] (!%p193_p9)  ;;  %v342_v31 = vld [vmem:[%s2464_s1 + $0x80] sm:$0xff] (!%p193_p9)  ;;  %v343_v32 = vld [vmem:[%s2464_s1 + $0x88] sm:$0xff] (!%p193_p9)  ;;  %s1523_s16 = smul.u32 (!%p193_p9), 24, %s218_s15  ;;  %s2422_s6 = scalar_lea.sflag (!%p193_p9), [#allocation3], %s218_s15 }
  0x13   : > { %v404_v30 = vpack.c.bf16 (!%p193_p9), %v341_v29, %v340_v28  ;;  %v405_v33 = vpack.c.bf16 (!%p193_p9), %v343_v32, %v342_v31  ;;  %v344_v34 = vld [vmem:[%s2464_s1 + $0x90] sm:$0xff] (!%p193_p9)  ;;  %v345_v35 = vld [vmem:[%s2464_s1 + $0x98] sm:$0xff] (!%p193_p9)  ;;  %v346_v37 = vld [vmem:[%s2464_s1 + $0xa0] sm:$0xff] (!%p193_p9)  ;;  %s1576_s10 = sshll.u32 (!%p193_p9), %s1637_s8, 4  ;;  %s1577_s10 = int_to_ptr.vmem [resolvable:$false] %s1576_s10 }
  0x14   : > { %496 = vmatpush1.bf16.msra.mxu0 (!%p193_p9), %v398_v6  ;;  %1512 = vmatpush1.bf16.msra.mxu1 (!%p193_p9), %v398_v6  ;;  %v406_v36 = vpack.c.bf16 (!%p193_p9), %v345_v35, %v344_v34  ;;  %v347_v38 = vld [vmem:[%s2464_s1 + $0xa8] sm:$0xff] (!%p193_p9)  ;;  %v348_v39 = vld [vmem:[%s2464_s1 + $0xb0] sm:$0xf] (!%p193_p9)  ;;  %s2344_s17 = scalar_lea.vmem (!%p193_p9), [#allocation2], %s1523_s16 }
  0x15   : > { %s2476_s11 = smov (!%p222_p10, %s221_s11), 95  ;;  %497 = vmatprep.subr.bf16.mxu0 %v1636_v3  ;;  %1501 = vmatprep.subr.bf16.mxu1 %v1636_v3  ;;  %v407_v40 = vpack.c.bf16 %v347_v38, %v346_v37  ;;  %v408_v41 = vpack.c.bf16 %v348_v39, %v348_v39  ;;  %s1399_s25 = sshll.u32 %s2344_s17, 4  ;;  %s2416_s25 = int_to_ptr.vmem [resolvable:$true] %s1399_s25 }
  0x16   : > { %s1497_s23 = sshll.u32 %s2476_s11, 4  ;;  %s1572_s7 = scalar_lea.vmem %s2416_s25, 384 }
  0x17   : > { %s1750_s9 = scalar_lea.vmem %s2463_s0, %s1497_s23  ;;  %v491_v47 = vsel %vm489_vm1, %v408_v41, 0  ;;  %s1498_s23 = smul.u32 384, %s1691_s22 }
  0x18   : > { %v231_v12 = vld [vmem:[%s1750_s9 + $0x8] sm:$0xff]  ;;  %v233_v13 = vld [vmem:[%s1750_s9 + $0x18] sm:$0xff]  ;;  %498 = vmatpush1.bf16.msra.mxu0 %v399_v9  ;;  %1513 = vmatpush1.bf16.msra.mxu1 %v399_v9  ;;  %v230_v42 = vld [vmem:[%s1750_s9] sm:$0xff]  ;;  %p1573_p11 = scmp.ne.s32.totalorder %s2416_s25, %s1572_s7  ;;  %s1578_s11 = scalar_lea.vmem %s1577_s10, 768 }
  0x19   : > { %v279_v14 = vld [vmem:[%s1750_s9 + $0x188] sm:$0xff]  ;;  %v350_v15 = vpack.c.bf16 %v233_v13, %v231_v12  ;;  %v281_v16 = vld [vmem:[%s1750_s9 + $0x198] sm:$0xff]  ;;  %499 = vmatprep.subr.bf16.mxu0 %v1636_v3  ;;  %1502 = vmatprep.subr.bf16.mxu1 %v1636_v3  ;;  %v232_v43 = vld [vmem:[%s1750_s9 + $0x10] sm:$0xff]  ;;  %s2412_s30 = scalar_lea.hbm %s2468_s5, %s1498_s23  ;;  %p1579_p0 = scmp.lt.s32.totalorder %s2416_s25, %s1577_s10 }
  0x1a   : > { %v374_v17 = vpack.c.bf16 %v281_v16, %v279_v14  ;;  %v278_v44 = vld [vmem:[%s1750_s9 + $0x180] sm:$0xff]  ;;  %v280_v45 = vld [vmem:[%s1750_s9 + $0x190] sm:$0xff]  ;;  %v235_v46 = vld [vmem:[%s1750_s9 + $0x28] sm:$0xff]  ;;  %v349_v51 = vpack.c.bf16 %v232_v43, %v230_v42  ;;  %p1574_p12 = pnand %p1573_p11, %p1708_p5  ;;  %p1580_p1 = scmp.lt.s32.totalorder %s1578_s11, %s1572_s7 }
  0x1b   : > { %1468 = vmatprep.mubr.msk.bf16.mxu0 %vm416_vm0, %v350_v15  ;;  %v237_v48 = vld [vmem:[%s1750_s9 + $0x38] sm:$0xff]  ;;  %v283_v49 = vld [vmem:[%s1750_s9 + $0x1a8] sm:$0xff]  ;;  %v373_v52 = vpack.c.bf16 %v280_v45, %v278_v44  ;;  %v234_v55 = vld [vmem:[%s1750_s9 + $0x20] sm:$0xff] }
  0x1c   : > { %1480 = vmatprep.mubr.msk.bf16.mxu1 %vm416_vm0, %v374_v17  ;;  %500 = vmatpush1.bf16.msra.mxu0 %v400_v18  ;;  %v285_v50 = vld [vmem:[%s1750_s9 + $0x1b8] sm:$0xff]  ;;  %v352_v53 = vpack.c.bf16 %v237_v48, %v235_v46  ;;  %v236_v56 = vld [vmem:[%s1750_s9 + $0x30] sm:$0xff]  ;;  %v282_v57 = vld [vmem:[%s1750_s9 + $0x1a0] sm:$0xff]  ;;  %p1575_p13 = pneg %p1574_p12  ;;  %p1581_p2 = por %p1580_p1, %p1579_p0 }
  0x1d   : > { %1514 = vmatpush1.bf16.msra.mxu1 %v400_v18  ;;  %501 = vmatprep.subr.bf16.mxu0 %v1636_v3  ;;  %v376_v54 = vpack.c.bf16 %v285_v50, %v283_v49  ;;  %v284_v58 = vld [vmem:[%s1750_s9 + $0x1b0] sm:$0xff]  ;;  %v239_v59 = vld [vmem:[%s1750_s9 + $0x48] sm:$0xff]  ;;  %v241_v60 = vld [vmem:[%s1750_s9 + $0x58] sm:$0xff]  ;;  %v351_v63 = vpack.c.bf16 %v236_v56, %v234_v55 }
  0x1e   : > { %1503 = vmatprep.subr.bf16.mxu1 %v1636_v3  ;;  %v287_v61 = vld [vmem:[%s1750_s9 + $0x1c8] sm:$0xff]  ;;  %v289_v62 = vld [vmem:[%s1750_s9 + $0x1d8] sm:$0xff]  ;;  %v375_v0 = vpack.c.bf16 %v284_v58, %v282_v57  ;;  %v354_v1 = vpack.c.bf16 %v241_v60, %v239_v59  ;;  %v240_v4 = vld [vmem:[%s1750_s9 + $0x50] sm:$0xff]  ;;  %p1582_p3 = pnand %p1581_p2, %p1575_p13 }
  0x1f   : > { %v378_v2 = vpack.c.bf16 %v289_v62, %v287_v61  ;;  %v286_v5 = vld [vmem:[%s1750_s9 + $0x1c0] sm:$0xff]  ;;  %v288_v6 = vld [vmem:[%s1750_s9 + $0x1d0] sm:$0xff]  ;;  %v243_v7 = vld [vmem:[%s1750_s9 + $0x68] sm:$0xff] }
  0x20   : > { %502 = vmatpush1.bf16.msra.mxu0 %v401_v21  ;;  %v245_v8 = vld [vmem:[%s1750_s9 + $0x78] sm:$0xff]  ;;  %v291_v9 = vld [vmem:[%s1750_s9 + $0x1e8] sm:$0xff]  ;;  %v377_v12 = vpack.c.bf16 %v288_v6, %v286_v5  ;;  %v242_v15 = vld [vmem:[%s1750_s9 + $0x60] sm:$0xff] }
  0x21   : > { %1515 = vmatpush1.bf16.msra.mxu1 %v401_v21  ;;  %503 = vmatprep.subr.bf16.mxu0 %v1636_v3  ;;  %v293_v10 = vld [vmem:[%s1750_s9 + $0x1f8] sm:$0xff]  ;;  %v356_v13 = vpack.c.bf16 %v245_v8, %v243_v7  ;;  %v244_v16 = vld [vmem:[%s1750_s9 + $0x70] sm:$0xff]  ;;  %v290_v17 = vld [vmem:[%s1750_s9 + $0x1e0] sm:$0xff] }
  0x22   : > { %1504 = vmatprep.subr.bf16.mxu1 %v1636_v3  ;;  %v380_v14 = vpack.c.bf16 %v293_v10, %v291_v9  ;;  %v292_v18 = vld [vmem:[%s1750_s9 + $0x1f0] sm:$0xff]  ;;  %v247_v19 = vld [vmem:[%s1750_s9 + $0x88] sm:$0xff]  ;;  %v249_v20 = vld [vmem:[%s1750_s9 + $0x98] sm:$0xff]  ;;  %v355_v23 = vpack.c.bf16 %v244_v16, %v242_v15 }
  0x23   : > { %v295_v21 = vld [vmem:[%s1750_s9 + $0x208] sm:$0xff]  ;;  %v297_v22 = vld [vmem:[%s1750_s9 + $0x218] sm:$0xff]  ;;  %v358_v25 = vpack.c.bf16 %v249_v20, %v247_v19  ;;  %v248_v28 = vld [vmem:[%s1750_s9 + $0x90] sm:$0xff] }
  0x24   : > { %504 = vmatpush1.bf16.msra.mxu0 %v402_v24  ;;  %v382_v26 = vpack.c.bf16 %v297_v22, %v295_v21  ;;  %v294_v29 = vld [vmem:[%s1750_s9 + $0x200] sm:$0xff]  ;;  %v251_v31 = vld [vmem:[%s1750_s9 + $0xa8] sm:$0xff]  ;;  %v253_v32 = vld [vmem:[%s1750_s9 + $0xb8] sm:$0xff] }
  0x25   : > { %1516 = vmatpush1.bf16.msra.mxu1 %v402_v24  ;;  %505 = vmatprep.subr.bf16.mxu0 %v1636_v3  ;;  %v379_v24 = vpack.c.bf16 %v292_v18, %v290_v17  ;;  %v301_v34 = vld [vmem:[%s1750_s9 + $0x238] sm:$0xff]  ;;  %v360_v37 = vpack.c.bf16 %v253_v32, %v251_v31  ;;  %v250_v39 = vld [vmem:[%s1750_s9 + $0xa0] sm:$0xff]  ;;  %v300_v42 = vld [vmem:[%s1750_s9 + $0x230] sm:$0xff] }
  0x26   : > { %1505 = vmatprep.subr.bf16.mxu1 %v1636_v3  ;;  %v298_v41 = vld [vmem:[%s1750_s9 + $0x220] sm:$0xff]  ;;  %v255_v43 = vld [vmem:[%s1750_s9 + $0xc8] sm:$0xff]  ;;  %v257_v44 = vld [vmem:[%s1750_s9 + $0xd8] sm:$0xff] }
  0x27   : > { %v303_v45 = vld [vmem:[%s1750_s9 + $0x248] sm:$0xff]  ;;  %v305_v46 = vld [vmem:[%s1750_s9 + $0x258] sm:$0xff]  ;;  %v383_v48 = vpack.c.bf16 %v300_v42, %v298_v41  ;;  %v362_v49 = vpack.c.bf16 %v257_v44, %v255_v43 }
  0x28   : > { %506 = vmatpush1.bf16.msra.mxu0 %v403_v27  ;;  %v386_v50 = vpack.c.bf16 %v305_v46, %v303_v45  ;;  %v259_v55 = vld [vmem:[%s1750_s9 + $0xe8] sm:$0xff]  ;;  %v261_v56 = vld [vmem:[%s1750_s9 + $0xf8] sm:$0xff] }
  0x29   : > { %1517 = vmatpush1.bf16.msra.mxu1 %v403_v27  ;;  %507 = vmatprep.subr.bf16.mxu0 %v1636_v3  ;;  %v246_v27 = vld [vmem:[%s1750_s9 + $0x80] sm:$0xff]  ;;  %v307_v57 = vld [vmem:[%s1750_s9 + $0x268] sm:$0xff]  ;;  %v309_v58 = vld [vmem:[%s1750_s9 + $0x278] sm:$0xff]  ;;  %v364_v61 = vpack.c.bf16 %v261_v56, %v259_v55 }
  0x2a   : > { %1506 = vmatprep.subr.bf16.mxu1 %v1636_v3  ;;  %v357_v35 = vpack.c.bf16 %v248_v28, %v246_v27  ;;  %v388_v62 = vpack.c.bf16 %v309_v58, %v307_v57  ;;  %v311_v5 = vld [vmem:[%s1750_s9 + $0x288] sm:$0xff]  ;;  %v313_v6 = vld [vmem:[%s1750_s9 + $0x298] sm:$0xff] }
  0x2b   : > { %v390_v10 = vpack.c.bf16 %v313_v6, %v311_v5  ;;  %v267_v15 = vld [vmem:[%s1750_s9 + $0x128] sm:$0xff]  ;;  %v269_v16 = vld [vmem:[%s1750_s9 + $0x138] sm:$0xff] }
  0x2c   : > { %508 = vmatpush1.bf16.msra.mxu0 %v404_v30  ;;  %v315_v17 = vld [vmem:[%s1750_s9 + $0x2a8] sm:$0xff]  ;;  %v317_v18 = vld [vmem:[%s1750_s9 + $0x2b8] sm:$0xff]  ;;  %v368_v21 = vpack.c.bf16 %v269_v16, %v267_v15 }
  0x2d   : > { %1518 = vmatpush1.bf16.msra.mxu1 %v404_v30  ;;  %509 = vmatprep.subr.bf16.mxu0 %v1636_v3  ;;  %v296_v30 = vld [vmem:[%s1750_s9 + $0x210] sm:$0xff]  ;;  %v392_v22 = vpack.c.bf16 %v317_v18, %v315_v17  ;;  %v271_v27 = vld [vmem:[%s1750_s9 + $0x148] sm:$0xff]  ;;  %v273_v28 = vld [vmem:[%s1750_s9 + $0x158] sm:$0xff] }
  0x2e   : > { %1507 = vmatprep.subr.bf16.mxu1 %v1636_v3  ;;  %v323_v41 = vld [vmem:[%s1750_s9 + $0x2e8] sm:$0xff]  ;;  %v325_v42 = vld [vmem:[%s1750_s9 + $0x2f8] sm:$0xff] }
  0x2f   : > { %v396_v46 = vpack.c.bf16 %v325_v42, %v323_v41 }
  0x30   : > { %510 = vmatpush1.bf16.msra.mxu0 %v405_v33 }
  0x31   : > { %1519 = vmatpush1.bf16.msra.mxu1 %v405_v33  ;;  %511 = vmatprep.subr.bf16.mxu0 %v1636_v3  ;;  %v299_v33 = vld [vmem:[%s1750_s9 + $0x228] sm:$0xff] }
  0x32   : > { %1508 = vmatprep.subr.bf16.mxu1 %v1636_v3  ;;  %v384_v38 = vpack.c.bf16 %v301_v34, %v299_v33  ;;  %v370_v33 = vpack.c.bf16 %v273_v28, %v271_v27 }
  0x34   : > { %512 = vmatpush1.bf16.msra.mxu0 %v406_v36 }
  0x35   : > { %1520 = vmatpush1.bf16.msra.mxu1 %v406_v36  ;;  %513 = vmatprep.subr.bf16.mxu0 %v1636_v3  ;;  %v381_v36 = vpack.c.bf16 %v296_v30, %v294_v29  ;;  %v319_v29 = vld [vmem:[%s1750_s9 + $0x2c8] sm:$0xff]  ;;  %v321_v30 = vld [vmem:[%s1750_s9 + $0x2d8] sm:$0xff] }
  0x36   : > { %1509 = vmatprep.subr.bf16.mxu1 %v1636_v3  ;;  %v394_v34 = vpack.c.bf16 %v321_v30, %v319_v29 }
  0x38   : > { %514 = vmatpush1.bf16.msra.mxu0 %v407_v40 }
  0x39   : > { %1521 = vmatpush1.bf16.msra.mxu1 %v407_v40  ;;  %515 = vmatprep.subr.bf16.mxu0 %v1636_v3  ;;  %v252_v40 = vld [vmem:[%s1750_s9 + $0xb0] sm:$0xff] }
  0x3a   : > { %1510 = vmatprep.subr.bf16.mxu1 %v1636_v3  ;;  %v238_v3 = vld [vmem:[%s1750_s9 + $0x40] sm:$0xff] }
  0x3b   : > { %v353_v11 = vpack.c.bf16 %v240_v4, %v238_v3  ;;  %v263_v3 = vld [vmem:[%s1750_s9 + $0x108] sm:$0xff]  ;;  %v265_v4 = vld [vmem:[%s1750_s9 + $0x118] sm:$0xff] }
  0x3c   : > { %516 = vmatpush1.bf16.msra.mxu0 %v491_v47  ;;  %v366_v9 = vpack.c.bf16 %v265_v4, %v263_v3 }
  0x3d   : > { %1522 = vmatpush1.bf16.msra.mxu1 %v491_v47  ;;  %v359_v47 = vpack.c.bf16 %v252_v40, %v250_v39  ;;  %v275_v39 = vld [vmem:[%s1750_s9 + $0x168] sm:$0xff]  ;;  %v277_v40 = vld [vmem:[%s1750_s9 + $0x178] sm:$0xff] }
  0x3e   : > { %v372_v45 = vpack.c.bf16 %v277_v40, %v275_v39 }
  0x3f   : > { %526 = vmatmul.mubr.bf16.vlgmr.msra.gmra.mrb[0].mxu0 %v349_v51  ;;  %v254_v51 = vld [vmem:[%s1750_s9 + $0xc0] sm:$0xff] }
  0x40   : > { %622 = vmatmul.mubr.bf16.vlgmr.msra.gmra.mrb[0].mxu1 %v373_v52  ;;  %1469 = vmatprep.mubr.msk.bf16.mxu0 %vm416_vm0, %v352_v53  ;;  %v256_v52 = vld [vmem:[%s1750_s9 + $0xd0] sm:$0xff]  ;;  %v302_v53 = vld [vmem:[%s1750_s9 + $0x240] sm:$0xff] }
  0x41   : > { %1481 = vmatprep.mubr.msk.bf16.mxu1 %vm416_vm0, %v376_v54  ;;  %v304_v54 = vld [vmem:[%s1750_s9 + $0x250] sm:$0xff]  ;;  %v361_v59 = vpack.c.bf16 %v256_v52, %v254_v51 }
  0x42   : > { %v385_v60 = vpack.c.bf16 %v304_v54, %v302_v53  ;;  %v1940_v53 = vld [vmem:[%s2465_s2] ss:$0 sm:$0xff] }
  0x47   : > { %534 = vmatmul.mubr.bf16.gmra.mrb[4].mxu0 %v351_v63  ;;  %v258_v63 = vld [vmem:[%s1750_s9 + $0xe0] sm:$0xff] }
  0x48   : > { %630 = vmatmul.mubr.bf16.gmra.mrb[4].mxu1 %v375_v0  ;;  %1470 = vmatprep.mubr.msk.bf16.mxu0 %vm416_vm0, %v354_v1  ;;  %v260_v0 = vld [vmem:[%s1750_s9 + $0xf0] sm:$0xff]  ;;  %v306_v1 = vld [vmem:[%s1750_s9 + $0x260] sm:$0xff] }
  0x49   : > { %1482 = vmatprep.mubr.msk.bf16.mxu1 %vm416_vm0, %v378_v2  ;;  %v308_v2 = vld [vmem:[%s1750_s9 + $0x270] sm:$0xff]  ;;  %v363_v7 = vpack.c.bf16 %v260_v0, %v258_v63 }
  0x4a   : > { %v387_v8 = vpack.c.bf16 %v308_v2, %v306_v1 }
  0x4f   : > { %542 = vmatmul.mubr.bf16.gmra.mrb[8].mxu0 %v353_v11  ;;  %v262_v11 = vld [vmem:[%s1750_s9 + $0x100] sm:$0xff] }
  0x50   : > { %638 = vmatmul.mubr.bf16.gmra.mrb[8].mxu1 %v377_v12  ;;  %1471 = vmatprep.mubr.msk.bf16.mxu0 %vm416_vm0, %v356_v13  ;;  %v264_v12 = vld [vmem:[%s1750_s9 + $0x110] sm:$0xff]  ;;  %v310_v13 = vld [vmem:[%s1750_s9 + $0x280] sm:$0xff] }
  0x51   : > { %1483 = vmatprep.mubr.msk.bf16.mxu1 %vm416_vm0, %v380_v14  ;;  %v312_v14 = vld [vmem:[%s1750_s9 + $0x290] sm:$0xff]  ;;  %v365_v19 = vpack.c.bf16 %v264_v12, %v262_v11 }
  0x52   : > { %v389_v20 = vpack.c.bf16 %v312_v14, %v310_v13 }
  0x57   : > { %550 = vmatmul.mubr.bf16.gmra.mrb[12].mxu0 %v355_v23  ;;  %v266_v23 = vld [vmem:[%s1750_s9 + $0x120] sm:$0xff] }
  0x58   : > { %646 = vmatmul.mubr.bf16.gmra.mrb[12].mxu1 %v379_v24  ;;  %1472 = vmatprep.mubr.msk.bf16.mxu0 %vm416_vm0, %v358_v25  ;;  %v268_v24 = vld [vmem:[%s1750_s9 + $0x130] sm:$0xff]  ;;  %v314_v25 = vld [vmem:[%s1750_s9 + $0x2a0] sm:$0xff] }
  0x59   : > { %1484 = vmatprep.mubr.msk.bf16.mxu1 %vm416_vm0, %v382_v26  ;;  %v316_v26 = vld [vmem:[%s1750_s9 + $0x2b0] sm:$0xff]  ;;  %v367_v31 = vpack.c.bf16 %v268_v24, %v266_v23 }
  0x5a   : > { %v391_v32 = vpack.c.bf16 %v316_v26, %v314_v25 }
  0x5f   : > { %558 = vmatmul.mubr.bf16.gmra.mrb[16].mxu0 %v357_v35  ;;  %v270_v35 = vld [vmem:[%s1750_s9 + $0x140] sm:$0xff] }
  0x60   : > { %654 = vmatmul.mubr.bf16.gmra.mrb[16].mxu1 %v381_v36  ;;  %1473 = vmatprep.mubr.msk.bf16.mxu0 %vm416_vm0, %v360_v37  ;;  %v272_v36 = vld [vmem:[%s1750_s9 + $0x150] sm:$0xff]  ;;  %v318_v37 = vld [vmem:[%s1750_s9 + $0x2c0] sm:$0xff] }
  0x61   : > { %1485 = vmatprep.mubr.msk.bf16.mxu1 %vm416_vm0, %v384_v38  ;;  %v320_v38 = vld [vmem:[%s1750_s9 + $0x2d0] sm:$0xff]  ;;  %v369_v43 = vpack.c.bf16 %v272_v36, %v270_v35 }
  0x62   : > { %v393_v44 = vpack.c.bf16 %v320_v38, %v318_v37 }
  0x67   : > { %566 = vmatmul.mubr.bf16.gmra.mrb[20].mxu0 %v359_v47  ;;  %v274_v47 = vld [vmem:[%s1750_s9 + $0x160] sm:$0xff] }
  0x68   : > { %662 = vmatmul.mubr.bf16.gmra.mrb[20].mxu1 %v383_v48  ;;  %1474 = vmatprep.mubr.msk.bf16.mxu0 %vm416_vm0, %v362_v49  ;;  %v276_v48 = vld [vmem:[%s1750_s9 + $0x170] sm:$0xff]  ;;  %v322_v49 = vld [vmem:[%s1750_s9 + $0x2e0] sm:$0xff] }
  0x69   : > { %1486 = vmatprep.mubr.msk.bf16.mxu1 %vm416_vm0, %v386_v50  ;;  %v324_v50 = vld [vmem:[%s1750_s9 + $0x2f0] sm:$0xff]  ;;  %v371_v51 = vpack.c.bf16 %v276_v48, %v274_v47 }
  0x6a   : > { %v395_v52 = vpack.c.bf16 %v324_v50, %v322_v49 }
  0x6f   : > { %574 = vmatmul.mubr.bf16.gmra.mrb[24].mxu0 %v361_v59 }
  0x70   : > { %670 = vmatmul.mubr.bf16.gmra.mrb[24].mxu1 %v385_v60  ;;  %1475 = vmatprep.mubr.msk.bf16.mxu0 %vm416_vm0, %v364_v61 }
  0x71   : > { %1487 = vmatprep.mubr.msk.bf16.mxu1 %vm416_vm0, %v388_v62 }
  0x77   : > { %582 = vmatmul.mubr.bf16.gmra.mrb[28].mxu0 %v363_v7 }
  0x78   : > { %678 = vmatmul.mubr.bf16.gmra.mrb[28].mxu1 %v387_v8  ;;  %1476 = vmatprep.mubr.msk.bf16.mxu0 %vm416_vm0, %v366_v9 }
  0x79   : > { %1488 = vmatprep.mubr.msk.bf16.mxu1 %vm416_vm0, %v390_v10 }
  0x7f   : > { %590 = vmatmul.mubr.bf16.gmra.mrb[32].mxu0 %v365_v19 }
  0x80   : > { %686 = vmatmul.mubr.bf16.gmra.mrb[32].mxu1 %v389_v20  ;;  %1477 = vmatprep.mubr.msk.bf16.mxu0 %vm416_vm0, %v368_v21 }
  0x81   : > { %1489 = vmatprep.mubr.msk.bf16.mxu1 %vm416_vm0, %v392_v22 }
  0x87   : > { %598 = vmatmul.mubr.bf16.gmra.mrb[36].mxu0 %v367_v31 }
  0x88   : > { %694 = vmatmul.mubr.bf16.gmra.mrb[36].mxu1 %v391_v32  ;;  %1478 = vmatprep.mubr.msk.bf16.mxu0 %vm416_vm0, %v370_v33 }
  0x89   : > { %1490 = vmatprep.mubr.msk.bf16.mxu1 %vm416_vm0, %v394_v34 }
  0x8f   : > { %606 = vmatmul.mubr.bf16.gmra.mrb[40].mxu0 %v369_v43 }
  0x90   : > { %702 = vmatmul.mubr.bf16.gmra.mrb[40].mxu1 %v393_v44  ;;  %1479 = vmatprep.mubr.msk.bf16.mxu0 %vm416_vm0, %v372_v45 }
  0x91   : > { %1491 = vmatprep.mubr.msk.bf16.mxu1 %vm416_vm0, %v396_v46 }
  0x97   : > { %614 = vmatmul.mubr.bf16.gmra.mrb[44].mxu0 %v371_v51 }
  0x98   : > { %710 = vmatmul.mubr.bf16.gmra.mrb[44].mxu1 %v395_v52 }
 0x112   : > { %v527_v54 = vpop.f32.mrb[0].mxu0 }
 0x113   : > { %v623_v55 = vpop.f32.mrb[0].mxu1  ;;  %v528_v56 = vadd.f32 %v1940_v53, %v527_v54  ;;  %v529_v58 = vpop.f32.mrb[1].mxu0 }
 0x114   : > { %v624_v57 = vadd.f32 %v1940_v53, %v623_v55  ;;  %v625_v59 = vpop.f32.mrb[1].mxu1  ;;  %v530_v60 = vpop.f32.mrb[2].mxu0 }
 0x115   : > { %v626_v61 = vpop.f32.mrb[2].mxu1  ;;  %v531_v63 = vadd.f32 %v1940_v53, %v530_v60  ;;  %v532_v1 = vpop.f32.mrb[3].mxu0  ;;  %v718_v3 = vmax.f32 %v528_v56, 0.0 }
 0x116   : > { %v742_v62 = vmax.f32 %v624_v57, 0.0  ;;  %v627_v0 = vadd.f32 %v1940_v53, %v626_v61  ;;  %v628_v2 = vpop.f32.mrb[3].mxu1 }
 0x117   : > { %v719_v4 = vmax.f32 %v531_v63, 0.0 }
 0x118   : > { %v743_v5 = vmax.f32 %v627_v0, 0.0 }
 0x119   : > { %v1946_v6 = vmax.f32 %v718_v3, %v719_v4 }
 0x11a   : > { %v1948_v7 = vmax.f32 %v742_v62, %v743_v5  ;;  %v535_v8 = vpop.f32.mrb[4].mxu0 }
 0x11b   : > { %v631_v9 = vpop.f32.mrb[4].mxu1  ;;  %v537_v11 = vpop.f32.mrb[5].mxu0  ;;  %v536_v13 = vadd.f32 %v1940_v53, %v535_v8 }
 0x11c   : > { %v632_v10 = vadd.f32 %v1940_v53, %v631_v9  ;;  %v633_v12 = vpop.f32.mrb[5].mxu1  ;;  %v538_v14 = vpop.f32.mrb[6].mxu0 }
 0x11d   : > { %v634_v15 = vpop.f32.mrb[6].mxu1  ;;  %v540_v16 = vpop.f32.mrb[7].mxu0  ;;  %v539_v19 = vadd.f32 %v1940_v53, %v538_v14  ;;  %v720_v21 = vmax.f32 %v536_v13, 0.0 }
 0x11e   : > { %v636_v17 = vpop.f32.mrb[7].mxu1  ;;  %v744_v18 = vmax.f32 %v632_v10, 0.0  ;;  %v635_v20 = vadd.f32 %v1940_v53, %v634_v15 }
 0x11f   : > { %v721_v22 = vmax.f32 %v539_v19, 0.0 }
 0x120   : > { %v745_v23 = vmax.f32 %v635_v20, 0.0 }
 0x121   : > { %v1954_v24 = vmax.f32 %v720_v21, %v721_v22 }
 0x122   : > { %v1956_v25 = vmax.f32 %v744_v18, %v745_v23  ;;  %v543_v26 = vpop.f32.mrb[8].mxu0 }
 0x123   : > { %v639_v27 = vpop.f32.mrb[8].mxu1  ;;  %v545_v29 = vpop.f32.mrb[9].mxu0  ;;  %v544_v31 = vadd.f32 %v1940_v53, %v543_v26 }
 0x124   : > { %v640_v28 = vadd.f32 %v1940_v53, %v639_v27  ;;  %v641_v30 = vpop.f32.mrb[9].mxu1  ;;  %v546_v32 = vpop.f32.mrb[10].mxu0 }
 0x125   : > { %v642_v33 = vpop.f32.mrb[10].mxu1  ;;  %v548_v34 = vpop.f32.mrb[11].mxu0  ;;  %v547_v37 = vadd.f32 %v1940_v53, %v546_v32  ;;  %v722_v39 = vmax.f32 %v544_v31, 0.0 }
 0x126   : > { %v644_v35 = vpop.f32.mrb[11].mxu1  ;;  %v746_v36 = vmax.f32 %v640_v28, 0.0  ;;  %v643_v38 = vadd.f32 %v1940_v53, %v642_v33 }
 0x127   : > { %v723_v40 = vmax.f32 %v547_v37, 0.0 }
 0x128   : > { %v747_v41 = vmax.f32 %v643_v38, 0.0  ;;  %v774_v38 = vrot.slane %v1954_v24, 4 }
 0x129   : > { %v1962_v42 = vmax.f32 %v722_v39, %v723_v40 }
 0x12a   : > { %v1964_v43 = vmax.f32 %v746_v36, %v747_v41  ;;  %v551_v44 = vpop.f32.mrb[12].mxu0  ;;  %v767_v36 = vrot.slane %v1946_v6, 4 }
 0x12b   : > { %v647_v45 = vpop.f32.mrb[12].mxu1  ;;  %v552_v46 = vadd.f32 %v1940_v53, %v551_v44  ;;  %v553_v48 = vpop.f32.mrb[13].mxu0  ;;  %v781_v40 = vrot.slane %v1962_v42, 4 }
 0x12c   : > { %v648_v47 = vadd.f32 %v1940_v53, %v647_v45  ;;  %v649_v49 = vpop.f32.mrb[13].mxu1  ;;  %v554_v50 = vpop.f32.mrb[14].mxu0 }
 0x12d   : > { %v650_v51 = vpop.f32.mrb[14].mxu1  ;;  %v555_v54 = vadd.f32 %v1940_v53, %v554_v50  ;;  %v556_v56 = vpop.f32.mrb[15].mxu0  ;;  %v724_v58 = vmax.f32 %v552_v46, 0.0  ;;  %v768_v50 = vmax.f32 %v1946_v6, %v767_v36 }
 0x12e   : > { %v748_v52 = vmax.f32 %v648_v47, 0.0  ;;  %v651_v55 = vadd.f32 %v1940_v53, %v650_v51  ;;  %v652_v57 = vpop.f32.mrb[15].mxu1 }
 0x12f   : > { %v725_v59 = vmax.f32 %v555_v54, 0.0  ;;  %v769_v6 = vrot.slane %v768_v50, 2 }
 0x130   : > { %v749_v60 = vmax.f32 %v651_v55, 0.0  ;;  %v775_v55 = vmax.f32 %v1954_v24, %v774_v38 }
 0x131   : > { %v1970_v61 = vmax.f32 %v724_v58, %v725_v59 }
 0x132   : > { %v1972_v62 = vmax.f32 %v748_v52, %v749_v60  ;;  %v559_v63 = vpop.f32.mrb[16].mxu0  ;;  %v782_v60 = vmax.f32 %v1962_v42, %v781_v40 }
 0x133   : > { %v655_v0 = vpop.f32.mrb[16].mxu1  ;;  %v561_v2 = vpop.f32.mrb[17].mxu0  ;;  %v560_v4 = vadd.f32 %v1940_v53, %v559_v63  ;;  %v788_v51 = vrot.slane %v1970_v61, 4 }
 0x134   : > { %v656_v1 = vadd.f32 %v1940_v53, %v655_v0  ;;  %v657_v3 = vpop.f32.mrb[17].mxu1  ;;  %v562_v5 = vpop.f32.mrb[18].mxu0 }
 0x135   : > { %v658_v8 = vpop.f32.mrb[18].mxu1  ;;  %v564_v9 = vpop.f32.mrb[19].mxu0  ;;  %v563_v12 = vadd.f32 %v1940_v53, %v562_v5  ;;  %v726_v14 = vmax.f32 %v560_v4, 0.0  ;;  %v789_v4 = vmax.f32 %v1970_v61, %v788_v51 }
 0x136   : > { %v660_v10 = vpop.f32.mrb[19].mxu1  ;;  %v750_v11 = vmax.f32 %v656_v1, 0.0  ;;  %v659_v13 = vadd.f32 %v1940_v53, %v658_v8  ;;  %v776_v8 = vrot.slane %v775_v55, 2 }
 0x137   : > { %v727_v15 = vmax.f32 %v563_v12, 0.0  ;;  %v783_v10 = vrot.slane %v782_v60, 2 }
 0x138   : > { %v751_v16 = vmax.f32 %v659_v13, 0.0 }
 0x139   : > { %v794_v17 = vmax.f32 %v726_v14, %v727_v15 }
 0x13a   : > { %v1978_v18 = vmax.f32 %v750_v11, %v751_v16  ;;  %v567_v19 = vpop.f32.mrb[20].mxu0 }
 0x13b   : > { %v663_v20 = vpop.f32.mrb[20].mxu1  ;;  %v568_v21 = vadd.f32 %v1940_v53, %v567_v19  ;;  %v569_v23 = vpop.f32.mrb[21].mxu0  ;;  %v795_v56 = vrot.slane %v794_v17, 4 }
 0x13c   : > { %v664_v22 = vadd.f32 %v1940_v53, %v663_v20  ;;  %v665_v26 = vpop.f32.mrb[21].mxu1  ;;  %v570_v27 = vpop.f32.mrb[22].mxu0 }
 0x13d   : > { %v666_v28 = vpop.f32.mrb[22].mxu1  ;;  %v571_v29 = vadd.f32 %v1940_v53, %v570_v27  ;;  %v572_v30 = vpop.f32.mrb[23].mxu0  ;;  %v728_v34 = vmax.f32 %v568_v21, 0.0  ;;  %v796_v9 = vmax.f32 %v794_v17, %v795_v56  ;;  %v770_v21 = vmax.f32 %v768_v50, %v769_v6 }
 0x13e   : > { %v668_v31 = vpop.f32.mrb[23].mxu1  ;;  %v752_v32 = vmax.f32 %v664_v22, 0.0  ;;  %v667_v33 = vadd.f32 %v1940_v53, %v666_v28  ;;  %v790_v22 = vrot.slane %v789_v4, 2  ;;  %v777_v26 = vmax.f32 %v775_v55, %v776_v8 }
 0x13f   : > { %v729_v35 = vmax.f32 %v571_v29, 0.0  ;;  %v797_v17 = vrot.slane %v796_v9, 2  ;;  %v784_v31 = vmax.f32 %v782_v60, %v783_v10  ;;  %v771_v38 = vrot.slane %v770_v21, 1 }
 0x140   : > { %v753_v37 = vmax.f32 %v667_v33, 0.0  ;;  %v851_v60 = vrot.slane %v1948_v7, 4 }
 0x141   : > { %v801_v39 = vmax.f32 %v728_v34, %v729_v35 }
 0x142   : > { %v1987_v41 = vmax.f32 %v752_v32, %v753_v37  ;;  %v575_v44 = vpop.f32.mrb[24].mxu0 }
 0x143   : > { %v671_v45 = vpop.f32.mrb[24].mxu1  ;;  %v576_v46 = vadd.f32 %v1940_v53, %v575_v44  ;;  %v577_v48 = vpop.f32.mrb[25].mxu0  ;;  %v802_v63 = vrot.slane %v801_v39, 4  ;;  %v778_v44 = vrot.slane %v777_v26, 1 }
 0x144   : > { %v672_v47 = vadd.f32 %v1940_v53, %v671_v45  ;;  %v673_v49 = vpop.f32.mrb[25].mxu1  ;;  %v578_v52 = vpop.f32.mrb[26].mxu0  ;;  %v798_v45 = vmax.f32 %v796_v9, %v797_v17 }
 0x145   : > { %v674_v54 = vpop.f32.mrb[26].mxu1  ;;  %v579_v57 = vadd.f32 %v1940_v53, %v578_v52  ;;  %v580_v58 = vpop.f32.mrb[27].mxu0  ;;  %v730_v2 = vmax.f32 %v576_v46, 0.0  ;;  %v803_v11 = vmax.f32 %v801_v39, %v802_v63  ;;  %v791_v39 = vmax.f32 %v789_v4, %v790_v22 }
 0x146   : > { %v676_v59 = vpop.f32.mrb[27].mxu1  ;;  %v754_v0 = vmax.f32 %v672_v47, 0.0  ;;  %v675_v1 = vadd.f32 %v1940_v53, %v674_v54  ;;  %v785_v47 = vrot.slane %v784_v31, 1  ;;  %v858_v63 = vrot.slane %v1956_v25, 4 }
 0x147   : > { %v731_v3 = vmax.f32 %v579_v57, 0.0  ;;  %v804_v32 = vrot.slane %v803_v11, 2  ;;  %v2008_v59 = vmax.f32 %v770_v21, %v771_v38  ;;  %v799_v6 = vrot.slane %v798_v45, 1 }
 0x148   : > { %v755_v5 = vmax.f32 %v675_v1, 0.0 }
 0x149   : > { %v808_v24 = vmax.f32 %v730_v2, %v731_v3  ;;  %v805_v48 = vmax.f32 %v803_v11, %v804_v32  ;;  %v2012_v3 = vmax.f32 %v777_v26, %v778_v44  ;;  %v879_v44 = vrot.slane %v1978_v18, 4 }
 0x14a   : > { %v1998_v12 = vmax.f32 %v754_v0, %v755_v5  ;;  %v583_v13 = vpop.f32.mrb[28].mxu0  ;;  %v792_v0 = vrot.slane %v791_v39, 1 }
 0x14b   : > { %v679_v14 = vpop.f32.mrb[28].mxu1  ;;  %v809_v42 = vrot.slane %v808_v24, 4  ;;  %v584_v15 = vadd.f32 %v1940_v53, %v583_v13  ;;  %v585_v19 = vpop.f32.mrb[29].mxu0  ;;  %v806_v10 = vrot.slane %v805_v48, 1  ;;  %v959_v17 = vsel %vm958_vm2, %v2012_v3, %v2008_v59 }
 0x14c   : > { %v680_v16 = vadd.f32 %v1940_v53, %v679_v14  ;;  %v681_v20 = vpop.f32.mrb[29].mxu1  ;;  %v586_v61 = vpop.f32.mrb[30].mxu0  ;;  %v852_v19 = vmax.f32 %v1948_v7, %v851_v60  ;;  %v2020_v21 = vmax.f32 %v791_v39, %v792_v0 }
 0x14d   : > { %v682_v23 = vpop.f32.mrb[30].mxu1  ;;  %v810_v27 = vmax.f32 %v808_v24, %v809_v42  ;;  %v587_v28 = vadd.f32 %v1940_v53, %v586_v61  ;;  %v588_v29 = vpop.f32.mrb[31].mxu0  ;;  %v732_v36 = vmax.f32 %v584_v15, 0.0  ;;  %v2015_v24 = vmax.f32 %v784_v31, %v785_v47 }
 0x14e   : > { %v684_v30 = vpop.f32.mrb[31].mxu1  ;;  %v756_v33 = vmax.f32 %v680_v16, 0.0  ;;  %v683_v34 = vadd.f32 %v1940_v53, %v682_v23  ;;  %v859_v20 = vmax.f32 %v1956_v25, %v858_v63  ;;  %v2022_v61 = vmax.f32 %v798_v45, %v799_v6 }
 0x14f   : > { %v811_v35 = vrot.slane %v810_v27, 2  ;;  %v733_v37 = vmax.f32 %v587_v28, 0.0  ;;  %v2031_v30 = vmax.f32 %v805_v48, %v806_v10  ;;  %v961_v7 = vsel %vm960_vm3, %v2015_v24, %v959_v17 }
 0x150   : > { %v757_v40 = vmax.f32 %v683_v34, 0.0  ;;  %v963_v39 = vsel %vm962_vm4, %v2020_v21, %v961_v7  ;;  %v893_v10 = vrot.slane %v1998_v12, 4 }
 0x151   : > { %v815_v46 = vmax.f32 %v732_v36, %v733_v37  ;;  %v812_v52 = vmax.f32 %v810_v27, %v811_v35  ;;  %v853_v36 = vrot.slane %v852_v19, 2  ;;  %v965_v48 = vsel %vm964_vm5, %v2022_v61, %v963_v39 }
 0x152   : > { %v2004_v49 = vmax.f32 %v756_v33, %v757_v40  ;;  %v591_v50 = vpop.f32.mrb[32].mxu0  ;;  %v860_v40 = vrot.slane %v859_v20, 2 }
 0x153   : > { %v687_v51 = vpop.f32.mrb[32].mxu1  ;;  %v816_v54 = vrot.slane %v815_v46, 4  ;;  %v592_v55 = vadd.f32 %v1940_v53, %v591_v50  ;;  %v593_v57 = vpop.f32.mrb[33].mxu0  ;;  %v813_v16 = vrot.slane %v812_v52, 1  ;;  %v2053_v60 = vmax.f32 %v852_v19, %v853_v36 }
 0x154   : > { %v688_v56 = vadd.f32 %v1940_v53, %v687_v51  ;;  %v689_v58 = vpop.f32.mrb[33].mxu1  ;;  %v594_v1 = vpop.f32.mrb[34].mxu0 }
 0x155   : > { %v690_v2 = vpop.f32.mrb[34].mxu1  ;;  %v817_v4 = vmax.f32 %v815_v46, %v816_v54  ;;  %v595_v5 = vadd.f32 %v1940_v53, %v594_v1  ;;  %v596_v8 = vpop.f32.mrb[35].mxu0  ;;  %v734_v42 = vmax.f32 %v592_v55, 0.0  ;;  %v2037_v34 = vmax.f32 %v812_v52, %v813_v16 }
 0x156   : > { %v692_v9 = vpop.f32.mrb[35].mxu1  ;;  %v758_v11 = vmax.f32 %v688_v56, 0.0  ;;  %v691_v13 = vadd.f32 %v1940_v53, %v690_v2  ;;  %v967_v54 = vsel %vm966_vm6, %v2031_v30, %v965_v48  ;;  %v886_v55 = vrot.slane %v1987_v41, 4 }
 0x157   : > { %v818_v14 = vrot.slane %v817_v4, 2  ;;  %v735_v15 = vmax.f32 %v595_v5, 0.0  ;;  %v969_v58 = vsel %vm968_vm7, %v2037_v34, %v967_v54  ;;  %v880_v2 = vmax.f32 %v1978_v18, %v879_v44 }
 0x158   : > { %v759_v22 = vmax.f32 %v691_v13, 0.0  ;;  %v2058_v8 = vmax.f32 %v859_v20, %v860_v40  ;;  %v887_v9 = vmax.f32 %v1987_v41, %v886_v55  ;;  %v872_v48 = vrot.slane %v1972_v62, 4 }
 0x159   : > { %v2024_v23 = vmax.f32 %v734_v42, %v735_v15  ;;  %v819_v26 = vmax.f32 %v817_v4, %v818_v14  ;;  %v855_v42 = vrot.slane %v2053_v60, 1  ;;  %v900_v15 = vrot.slane %v2004_v49, 4 }
 0x15a   : > { %v2029_v27 = vmax.f32 %v758_v11, %v759_v22  ;;  %v599_v28 = vpop.f32.mrb[36].mxu0  ;;  %v865_v22 = vrot.slane %v1964_v43, 4 }
 0x15b   : > { %v695_v29 = vpop.f32.mrb[36].mxu1  ;;  %v600_v25 = vadd.f32 %v1940_v53, %v599_v28  ;;  %v601_v32 = vpop.f32.mrb[37].mxu0  ;;  %v820_v35 = vrot.slane %v819_v26, 1  ;;  %v823_v36 = vrot.slane %v2024_v23, 4 }
 0x15c   : > { %v696_v31 = vadd.f32 %v1940_v53, %v695_v29  ;;  %v697_v33 = vpop.f32.mrb[37].mxu1  ;;  %v602_v37 = vpop.f32.mrb[38].mxu0  ;;  %v907_v20 = vrot.slane %v2029_v27, 4  ;;  %v881_v29 = vrot.slane %v880_v2, 2  ;;  %v862_v32 = vrot.slane %v2058_v8, 1 }
 0x15d   : > { %v698_v38 = vpop.f32.mrb[38].mxu1  ;;  %v603_v45 = vadd.f32 %v1940_v53, %v602_v37  ;;  %v604_v46 = vpop.f32.mrb[39].mxu0  ;;  %v2046_v52 = vmax.f32 %v819_v26, %v820_v35  ;;  %v736_v56 = vmax.f32 %v600_v25, 0.0  ;;  %v888_v33 = vrot.slane %v887_v9, 2 }
 0x15e   : > { %v700_v47 = vpop.f32.mrb[39].mxu1  ;;  %v760_v50 = vmax.f32 %v696_v31, 0.0  ;;  %v699_v51 = vadd.f32 %v1940_v53, %v698_v38  ;;  %v894_v35 = vmax.f32 %v1998_v12, %v893_v10  ;;  %v901_v37 = vmax.f32 %v2004_v49, %v900_v15 }
 0x15f   : > { %v737_v57 = vmax.f32 %v603_v45, 0.0  ;;  %v971_v0 = vsel %vm970_vm8, %v2046_v52, %v969_v58  ;;  %v2075_v44 = vmax.f32 %v1964_v43, %v865_v22  ;;  %v908_v45 = vmax.f32 %v2029_v27, %v907_v20 }
 0x160   : > { %v761_v63 = vmax.f32 %v699_v51, 0.0  ;;  %989 = vadd.xlane.f32.xlu0 %v971_v0  ;;  %v824_v49 = vmax.f32 %v2024_v23, %v823_v36  ;;  %v889_v27 = vmax.f32 %v887_v9, %v888_v33  ;;  %v902_v0 = vrot.slane %v901_v37, 2 }
 0x161   : > { %v829_v1 = vmax.f32 %v736_v56, %v737_v57  ;;  %v895_v56 = vrot.slane %v894_v35, 2 }
 0x162   : > { %v913_v6 = vmax.f32 %v760_v50, %v761_v63  ;;  %v607_v4 = vpop.f32.mrb[40].mxu0  ;;  %v2079_v50 = vmax.f32 %v880_v2, %v881_v29  ;;  %v825_v20 = vrot.slane %v824_v49, 2  ;;  %v890_v36 = vrot.slane %v889_v27, 1 }
 0x163   : > { %v703_v5 = vpop.f32.mrb[40].mxu1  ;;  %v609_v13 = vpop.f32.mrb[41].mxu0  ;;  %v608_v16 = vadd.f32 %v1940_v53, %v607_v4  ;;  %v830_v26 = vrot.slane %v829_v1, 4  ;;  %v896_v22 = vmax.f32 %v894_v35, %v895_v56 }
 0x164   : > { %v704_v11 = vadd.f32 %v1940_v53, %v703_v5  ;;  %v705_v14 = vpop.f32.mrb[41].mxu1  ;;  %v610_v18 = vpop.f32.mrb[42].mxu0  ;;  %v914_v41 = vrot.slane %v913_v6, 4  ;;  %v909_v5 = vrot.slane %v908_v45, 2 }
 0x165   : > { %v706_v19 = vpop.f32.mrb[42].mxu1  ;;  %v612_v17 = vpop.f32.mrb[43].mxu0  ;;  %v611_v25 = vadd.f32 %v1940_v53, %v610_v18  ;;  %v738_v38 = vmax.f32 %v608_v16, 0.0  ;;  %v831_v46 = vmax.f32 %v829_v1, %v830_v26 }
 0x166   : > { %v708_v28 = vpop.f32.mrb[43].mxu1  ;;  %v762_v7 = vmax.f32 %v704_v11, 0.0  ;;  %v707_v31 = vadd.f32 %v1940_v53, %v706_v19  ;;  %v915_v47 = vmax.f32 %v913_v6, %v914_v41  ;;  %v903_v41 = vmax.f32 %v901_v37, %v902_v0 }
 0x167   : > { %v739_v39 = vmax.f32 %v611_v25, 0.0  ;;  %v832_v10 = vrot.slane %v831_v46, 2  ;;  %v910_v25 = vmax.f32 %v908_v45, %v909_v5  ;;  %v883_v37 = vrot.slane %v2079_v50, 1 }
 0x168   : > { %v763_v40 = vmax.f32 %v707_v31, 0.0  ;;  %v916_v11 = vrot.slane %v915_v47, 2 }
 0x169   : > { %v836_v51 = vmax.f32 %v738_v38, %v739_v39  ;;  %v833_v31 = vmax.f32 %v831_v46, %v832_v10  ;;  %v2089_v46 = vmax.f32 %v889_v27, %v890_v36 }
 0x16a   : > { %v920_v12 = vmax.f32 %v762_v7, %v763_v40  ;;  %v615_v54 = vpop.f32.mrb[44].mxu0  ;;  %v873_v7 = vmax.f32 %v1972_v62, %v872_v48  ;;  %v917_v38 = vmax.f32 %v915_v47, %v916_v11 }
 0x16b   : > { %v711_v55 = vpop.f32.mrb[44].mxu1  ;;  %v616_v57 = vadd.f32 %v1940_v53, %v615_v54  ;;  %v617_v58 = vpop.f32.mrb[45].mxu0  ;;  %v837_v1 = vrot.slane %v836_v51, 4  ;;  %v867_v54 = vrot.slane %v2075_v44, 2  ;;  %v834_v62 = vrot.slane %v833_v31, 1 }
 0x16c   : > { %v712_v43 = vadd.f32 %v1940_v53, %v711_v55  ;;  %v713_v63 = vpop.f32.mrb[45].mxu1  ;;  %v921_v6 = vrot.slane %v920_v12, 4  ;;  %v618_v4 = vpop.f32.mrb[46].mxu0  ;;  %v904_v55 = vrot.slane %v903_v41, 1  ;;  %v918_v48 = vrot.slane %v917_v38, 1 }
 0x16d   : > { %v714_v2 = vpop.f32.mrb[46].mxu1  ;;  %v619_v13 = vadd.f32 %v1940_v53, %v618_v4  ;;  %v620_v14 = vpop.f32.mrb[47].mxu0  ;;  %v838_v23 = vmax.f32 %v836_v51, %v837_v1  ;;  %v740_v9 = vmax.f32 %v616_v57, 0.0  ;;  %v897_v51 = vrot.slane %v896_v22, 1 }
 0x16e   : > { %v716_v15 = vpop.f32.mrb[47].mxu1  ;;  %v922_v16 = vmax.f32 %v920_v12, %v921_v6  ;;  %v764_v18 = vmax.f32 %v712_v43, 0.0  ;;  %v715_v19 = vadd.f32 %v1940_v53, %v714_v2  ;;  %v826_v12 = vmax.f32 %v824_v49, %v825_v20 }
 0x16f   : > { %v741_v26 = vmax.f32 %v619_v13, 0.0  ;;  %v839_v17 = vrot.slane %v838_v23, 2  ;;  %v874_v57 = vrot.slane %v873_v7, 2  ;;  %v911_v43 = vrot.slane %v910_v25, 1 }
 0x170   : > { %v923_v28 = vrot.slane %v922_v16, 2  ;;  %v765_v29 = vmax.f32 %v715_v19, 0.0  ;;  %v2091_v63 = vmax.f32 %v896_v22, %v897_v51  ;;  %v827_v49 = vrot.slane %v826_v12, 1 }
 0x171   : > { %v843_v33 = vmax.f32 %v740_v9, %v741_v26  ;;  %v840_v39 = vmax.f32 %v838_v23, %v839_v17  ;;  %v868_v6 = vmax.f32 %v2075_v44, %v867_v54  ;;  %v2095_v4 = vmax.f32 %v2079_v50, %v883_v37 }
 0x172   : > { %v927_v40 = vmax.f32 %v764_v18, %v765_v29  ;;  %v924_v53 = vmax.f32 %v922_v16, %v923_v28  ;;  %v2097_v2 = vmax.f32 %v903_v41, %v904_v55  ;;  %v2099_v10 = vmax.f32 %v910_v25, %v911_v43 }
 0x173   : > { %v844_v35 = vrot.slane %v843_v33, 4  ;;  %v841_v47 = vrot.slane %v840_v39, 1  ;;  %v2101_v27 = vmax.f32 %v833_v31, %v834_v62  ;;  %v875_v13 = vmax.f32 %v873_v7, %v874_v57 }
 0x174   : > { %v928_v56 = vrot.slane %v927_v40, 4  ;;  %v925_v1 = vrot.slane %v924_v53, 1  ;;  %v2105_v15 = vmax.f32 %v917_v38, %v918_v48  ;;  %v979_v44 = vsel %vm958_vm2, %v2089_v46, %v2095_v4 }
 0x175   : > { %v845_v45 = vmax.f32 %v843_v33, %v844_v35  ;;  %v2103_v14 = vmax.f32 %v840_v39, %v841_v47  ;;  %v2110_v50 = vmax.f32 %v826_v12, %v827_v49  ;;  %v980_v19 = vsel %vm960_vm3, %v2091_v63, %v979_v44 }
 0x176   : > { %v929_v58 = vmax.f32 %v927_v40, %v928_v56  ;;  %v2112_v18 = vmax.f32 %v924_v53, %v925_v1  ;;  %v869_v22 = vrot.slane %v868_v6, 1  ;;  %v981_v9 = vsel %vm962_vm4, %v2097_v2, %v980_v19 }
 0x177   : > { %v846_v0 = vrot.slane %v845_v45, 2  ;;  %v972_v26 = vsel %vm958_vm2, %v2101_v27, %v2110_v50  ;;  %v982_v17 = vsel %vm964_vm5, %v2099_v10, %v981_v9  ;;  %v876_v28 = vrot.slane %v875_v13, 1 }
 0x178   : > { %v930_v5 = vrot.slane %v929_v58, 2  ;;  %v2128_v29 = vmax.f32 %v2053_v60, %v855_v42  ;;  %v983_v25 = vsel %vm966_vm6, %v2105_v15, %v982_v17  ;;  %v973_v31 = vsel %vm960_vm3, %v2103_v14, %v972_v26 }
 0x179   : > { %v847_v11 = vmax.f32 %v845_v45, %v846_v0  ;;  %v2139_v33 = vmax.f32 %v2058_v8, %v862_v32  ;;  %v984_v36 = vsel %vm968_vm7, %v2112_v18, %v983_v25  ;;  %v2147_v38 = vmax.f32 %v868_v6, %v869_v22 }
 0x17a   : > { %v931_v23 = vmax.f32 %v929_v58, %v930_v5  ;;  %v2151_v40 = vmax.f32 %v875_v13, %v876_v28 }
 0x17b   : > { %v848_v16 = vrot.slane %v847_v11, 1 }
 0x17c   : > { %v932_v20 = vrot.slane %v931_v23, 1 }
 0x17d   : > { %v2121_v41 = vmax.f32 %v847_v11, %v848_v16 }
 0x17e   : > { %v2130_v7 = vmax.f32 %v931_v23, %v932_v20 }
 0x17f   : > { %v974_v60 = vsel %vm962_vm4, %v2121_v41, %v973_v31 }
 0x180   : > { %v985_v42 = vsel %vm970_vm8, %v2130_v7, %v984_v36  ;;  %v975_v39 = vsel %vm964_vm5, %v2128_v29, %v974_v60 }
 0x181   : > { %993 = vadd.xlane.f32.xlu1 %v985_v42  ;;  %v976_v8 = vsel %vm966_vm6, %v2139_v33, %v975_v39 }
 0x182   : > { %v977_v32 = vsel %vm968_vm7, %v2147_v38, %v976_v8 }
 0x183   : > { %v978_v51 = vsel %vm970_vm8, %v2151_v40, %v977_v32 }
 0x184   : > { %991 = vadd.xlane.f32.xlu0 %v978_v51 }
 0x1ed   : > { %v990_v12 = vpop.xlane.xlu0 %989 }
 0x1ee   : > { %v996_v53 = vmul.f32 0.0078125, %v990_v12 }
 0x1f0   : > { %v1002_v35 = vrot.slane %v996_v53, 1  ;;  %v1003_v54 = vrot.slane %v996_v53, 2  ;;  %v1004_v37 = vrot.slane %v996_v53, 3  ;;  %v1005_v55 = vrot.slane %v996_v53, 4 }
 0x1f1   : > { %v1006_v56 = vrot.slane %v996_v53, 5  ;;  %v1007_v57 = vrot.slane %v996_v53, 6  ;;  %v1008_v43 = vrot.slane %v996_v53, 7  ;;  %v2160_v62 = vsub.f32 %v2008_v59, %v996_v53 }
 0x1f2   : > { %v2163_v45 = vsub.f32 %v2012_v3, %v1002_v35  ;;  %v2166_v48 = vsub.f32 %v2015_v24, %v1003_v54  ;;  %v2169_v47 = vsub.f32 %v2020_v21, %v1004_v37  ;;  %v2172_v58 = vsub.f32 %v2022_v61, %v1005_v55 }
 0x1f3   : > { %v2175_v49 = vsub.f32 %v2031_v30, %v1006_v56  ;;  %v2178_v0 = vsub.f32 %v2037_v34, %v1007_v57  ;;  %v2181_v59 = vsub.f32 %v2046_v52, %v1008_v43  ;;  %v1071_v30 = vmul.f32 %v2160_v62, %v2160_v62 }
 0x1f4   : > { %v1072_v3 = vmul.f32 %v2163_v45, %v2163_v45  ;;  %v1073_v24 = vmul.f32 %v2166_v48, %v2166_v48  ;;  %v1074_v21 = vmul.f32 %v2169_v47, %v2169_v47  ;;  %v1075_v61 = vmul.f32 %v2172_v58, %v2172_v58 }
 0x1f5   : > { %v1076_v34 = vmul.f32 %v2175_v49, %v2175_v49  ;;  %v1077_v6 = vmul.f32 %v2178_v0, %v2178_v0  ;;  %v1078_v5 = vmul.f32 %v2181_v59, %v2181_v59 }
 0x1f6   : > { %v1119_v52 = vrot.slane %v1072_v3, 7  ;;  %v1121_v1 = vrot.slane %v1073_v24, 6  ;;  %v1123_v13 = vrot.slane %v1074_v21, 5  ;;  %v1125_v44 = vrot.slane %v1075_v61, 4 }
 0x1f7   : > { %v1127_v19 = vrot.slane %v1076_v34, 3  ;;  %v1129_v20 = vrot.slane %v1077_v6, 2  ;;  %v1131_v26 = vrot.slane %v1078_v5, 1 }
 0x1f8   : > { %v1120_v11 = vsel %vm958_vm2, %v1119_v52, %v1071_v30 }
 0x1f9   : > { %v1122_v23 = vsel %vm960_vm3, %v1121_v1, %v1120_v11 }
 0x1fa   : > { %v1124_v16 = vsel %vm962_vm4, %v1123_v13, %v1122_v23 }
 0x1fb   : > { %v1126_v22 = vsel %vm964_vm5, %v1125_v44, %v1124_v16 }
 0x1fc   : > { %v1128_v9 = vsel %vm966_vm6, %v1127_v19, %v1126_v22 }
 0x1fd   : > { %v1130_v17 = vsel %vm968_vm7, %v1129_v20, %v1128_v9 }
 0x1fe   : > { %v1132_v28 = vsel %vm970_vm8, %v1131_v26, %v1130_v17 }
 0x1ff   : > { %1164 = vadd.xlane.f32.xlu1 %v1132_v28 }
 0x20e   : > { %v994_v25 = vpop.xlane.xlu1 %993 }
 0x20f   : > { %v998_v31 = vmul.f32 0.0078125, %v994_v25 }
 0x211   : > { %v992_v36 = vpop.xlane.xlu0 %991  ;;  %v1016_v60 = vrot.slane %v998_v31, 1  ;;  %v1017_v42 = vrot.slane %v998_v31, 2  ;;  %v1018_v39 = vrot.slane %v998_v31, 3  ;;  %v1019_v8 = vrot.slane %v998_v31, 4 }
 0x212   : > { %v997_v32 = vmul.f32 0.0078125, %v992_v36  ;;  %v1020_v51 = vrot.slane %v998_v31, 5  ;;  %v1021_v12 = vrot.slane %v998_v31, 6  ;;  %v1022_v53 = vrot.slane %v998_v31, 7 }
 0x213   : > { %v2207_v35 = vsub.f32 %v2095_v4, %v998_v31  ;;  %v2210_v54 = vsub.f32 %v2089_v46, %v1016_v60  ;;  %v2213_v37 = vsub.f32 %v2091_v63, %v1017_v42  ;;  %v2216_v55 = vsub.f32 %v2097_v2, %v1018_v39 }
 0x214   : > { %v2219_v56 = vsub.f32 %v2099_v10, %v1019_v8  ;;  %v2222_v57 = vsub.f32 %v2105_v15, %v1020_v51  ;;  %v2225_v43 = vsub.f32 %v2112_v18, %v1021_v12  ;;  %v2228_v4 = vsub.f32 %v2130_v7, %v1022_v53 }
 0x215   : > { %v1088_v46 = vmul.f32 %v2210_v54, %v2210_v54  ;;  %v1089_v63 = vmul.f32 %v2213_v37, %v2213_v37  ;;  %v1090_v2 = vmul.f32 %v2216_v55, %v2216_v55  ;;  %v1087_v10 = vmul.f32 %v2207_v35, %v2207_v35 }
 0x216   : > { %v1091_v15 = vmul.f32 %v2219_v56, %v2219_v56  ;;  %v1092_v18 = vmul.f32 %v2222_v57, %v2222_v57  ;;  %v1093_v7 = vmul.f32 %v2225_v43, %v2225_v43  ;;  %v1094_v3 = vmul.f32 %v2228_v4, %v2228_v4 }
 0x217   : > { %v1147_v24 = vrot.slane %v1088_v46, 7  ;;  %v1149_v21 = vrot.slane %v1089_v63, 6  ;;  %v1009_v61 = vrot.slane %v997_v32, 1  ;;  %v1151_v30 = vrot.slane %v1090_v2, 5 }
 0x218   : > { %v1153_v34 = vrot.slane %v1091_v15, 4  ;;  %v1155_v52 = vrot.slane %v1092_v18, 3  ;;  %v1157_v1 = vrot.slane %v1093_v7, 2  ;;  %v1010_v5 = vrot.slane %v997_v32, 2 }
 0x219   : > { %v1148_v6 = vsel %vm958_vm2, %v1147_v24, %v1087_v10  ;;  %v1011_v11 = vrot.slane %v997_v32, 3  ;;  %v1012_v13 = vrot.slane %v997_v32, 4  ;;  %v1013_v44 = vrot.slane %v997_v32, 5 }
 0x21a   : > { %v1150_v23 = vsel %vm960_vm3, %v1149_v21, %v1148_v6  ;;  %v1014_v16 = vrot.slane %v997_v32, 6  ;;  %v1015_v19 = vrot.slane %v997_v32, 7  ;;  %v2250_v20 = vsub.f32 %v2110_v50, %v997_v32 }
 0x21b   : > { %v1152_v22 = vsel %vm962_vm4, %v1151_v30, %v1150_v23  ;;  %v2253_v9 = vsub.f32 %v2101_v27, %v1009_v61  ;;  %v2256_v26 = vsub.f32 %v2103_v14, %v1010_v5  ;;  %v2260_v28 = vsub.f32 %v2121_v41, %v1011_v11  ;;  %v2303_v23 = vld [vmem:[%s2466_s3] ss:$0 sm:$0xff] }
 0x21c   : > { %v1154_v17 = vsel %vm964_vm5, %v1153_v34, %v1152_v22  ;;  %v2263_v25 = vsub.f32 %v2128_v29, %v1012_v13  ;;  %v2266_v31 = vsub.f32 %v2139_v33, %v1013_v44  ;;  %v1159_v36 = vrot.slane %v1094_v3, 1 }
 0x21d   : > { %v1156_v50 = vsel %vm966_vm6, %v1155_v52, %v1154_v17  ;;  %v2270_v27 = vsub.f32 %v2147_v38, %v1014_v16  ;;  %v2273_v14 = vsub.f32 %v2151_v40, %v1015_v19  ;;  %v1080_v41 = vmul.f32 %v2253_v9, %v2253_v9 }
 0x21e   : > { %v1158_v60 = vsel %vm968_vm7, %v1157_v1, %v1156_v50  ;;  %v1081_v29 = vmul.f32 %v2256_v26, %v2256_v26  ;;  %v1082_v33 = vmul.f32 %v2260_v28, %v2260_v28  ;;  %v1083_v38 = vmul.f32 %v2263_v25, %v2263_v25 }
 0x21f   : > { %v1160_v42 = vsel %vm970_vm8, %v1159_v36, %v1158_v60  ;;  %v1079_v40 = vmul.f32 %v2250_v20, %v2250_v20  ;;  %v1084_v39 = vmul.f32 %v2266_v31, %v2266_v31  ;;  %v1133_v8 = vrot.slane %v1080_v41, 7 }
 0x220   : > { %1168 = vadd.xlane.f32.xlu1 %v1160_v42  ;;  %v1135_v32 = vrot.slane %v1081_v29, 6  ;;  %v1085_v51 = vmul.f32 %v2270_v27, %v2270_v27  ;;  %v1086_v12 = vmul.f32 %v2273_v14, %v2273_v14  ;;  %v1137_v46 = vrot.slane %v1082_v33, 5 }
 0x221   : > { %v1134_v53 = vsel %vm958_vm2, %v1133_v8, %v1079_v40  ;;  %v1139_v2 = vrot.slane %v1083_v38, 4  ;;  %v1141_v15 = vrot.slane %v1084_v39, 3 }
 0x222   : > { %v1136_v63 = vsel %vm960_vm3, %v1135_v32, %v1134_v53  ;;  %v1143_v7 = vrot.slane %v1085_v51, 2  ;;  %v1145_v24 = vrot.slane %v1086_v12, 1 }
 0x223   : > { %v1138_v10 = vsel %vm962_vm4, %v1137_v46, %v1136_v63 }
 0x224   : > { %v1140_v18 = vsel %vm964_vm5, %v1139_v2, %v1138_v10 }
 0x225   : > { %v1142_v3 = vsel %vm966_vm6, %v1141_v15, %v1140_v18 }
 0x226   : > { %v1144_v21 = vsel %vm968_vm7, %v1143_v7, %v1142_v3 }
 0x227   : > { %v1146_v61 = vsel %vm970_vm8, %v1145_v24, %v1144_v21 }
 0x228   : > { %1166 = vadd.xlane.f32.xlu0 %v1146_v61 }
 0x28c   : > { %v1165_v30 = vpop.xlane.xlu1 %1164 }
 0x28d   : > { %v1170_v34 = vmul.f32 0.0078125, %v1165_v30 }
 0x28f   : > { %v1173_v52 = vadd.f32 1e-05, %v1170_v34 }
 0x291   : > { %1566 = vrsqrt.f32 %v1173_v52 }
 0x29b   : > { %v1567_v1 = vpop.eup %1566 }
 0x29c   : > { %v1182_v6 = vrot.slane %v1567_v1, 1  ;;  %v1183_v5 = vrot.slane %v1567_v1, 2  ;;  %v1184_v11 = vrot.slane %v1567_v1, 3  ;;  %v1185_v13 = vrot.slane %v1567_v1, 4 }
 0x29d   : > { %v1186_v44 = vrot.slane %v1567_v1, 5  ;;  %v1187_v16 = vrot.slane %v1567_v1, 6  ;;  %v1188_v19 = vrot.slane %v1567_v1, 7  ;;  %v1227_v22 = vmul.f32 %v1567_v1, %v2160_v62 }
 0x29e   : > { %v1228_v17 = vmul.f32 %v1182_v6, %v2163_v45  ;;  %v1229_v50 = vmul.f32 %v1183_v5, %v2166_v48  ;;  %v1230_v36 = vmul.f32 %v1184_v11, %v2169_v47  ;;  %v1231_v60 = vmul.f32 %v1185_v13, %v2172_v58 }
 0x29f   : > { %v1232_v41 = vmul.f32 %v1186_v44, %v2175_v49  ;;  %v1233_v29 = vmul.f32 %v1187_v16, %v2178_v0  ;;  %v1234_v33 = vmul.f32 %v1188_v19, %v2181_v59  ;;  %v1258_v42 = vmul.f32 %v2303_v23, %v1227_v22  ;;  %v2323_v49 = vld [vmem:[%s2467_s4] ss:$0 sm:$0xff] }
 0x2a0   : > { %v1259_v38 = vmul.f32 %v2303_v23, %v1228_v17  ;;  %v1260_v62 = vmul.f32 %v2303_v23, %v1229_v50  ;;  %v1261_v45 = vmul.f32 %v2303_v23, %v1230_v36  ;;  %v1262_v48 = vmul.f32 %v2303_v23, %v1231_v60 }
 0x2a1   : > { %v1263_v47 = vmul.f32 %v2303_v23, %v1232_v41  ;;  %v1264_v58 = vmul.f32 %v2303_v23, %v1233_v29  ;;  %v1265_v0 = vmul.f32 %v2303_v23, %v1234_v33  ;;  %v1289_v32 = vadd.f32 %v2323_v49, %v1258_v42 }
 0x2a2   : > { %v1290_v59 = vadd.f32 %v2323_v49, %v1259_v38  ;;  %v1291_v40 = vadd.f32 %v2323_v49, %v1260_v62  ;;  %v1292_v39 = vadd.f32 %v2323_v49, %v1261_v45  ;;  %v1293_v8 = vadd.f32 %v2323_v49, %v1262_v48 }
 0x2a3   : > { %v1294_v51 = vadd.f32 %v2323_v49, %v1263_v47  ;;  %v1295_v46 = vadd.f32 %v2323_v49, %v1264_v58  ;;  %v1296_v63 = vadd.f32 %v2323_v49, %v1265_v0 }
 0x2a4   : > { %v1337_v12 = vrot.slane %v1290_v59, 7  ;;  %v1339_v53 = vrot.slane %v1291_v40, 6  ;;  %v1341_v10 = vrot.slane %v1292_v39, 5  ;;  %v1343_v18 = vrot.slane %v1293_v8, 4 }
 0x2a5   : > { %v1345_v3 = vrot.slane %v1294_v51, 3  ;;  %v1347_v21 = vrot.slane %v1295_v46, 2  ;;  %v1349_v30 = vrot.slane %v1296_v63, 1 }
 0x2a6   : > { %v1338_v2 = vsel %vm958_vm2, %v1337_v12, %v1289_v32 }
 0x2a7   : > { %v1340_v15 = vsel %vm960_vm3, %v1339_v53, %v1338_v2 }
 0x2a8   : > { %v1342_v7 = vsel %vm962_vm4, %v1341_v10, %v1340_v15 }
 0x2a9   : > { %v1344_v24 = vsel %vm964_vm5, %v1343_v18, %v1342_v7 }
 0x2aa   : > { %v1346_v61 = vsel %vm966_vm6, %v1345_v3, %v1344_v24 }
 0x2ab   : > { %v1348_v34 = vsel %vm968_vm7, %v1347_v21, %v1346_v61 }
 0x2ac   : > { %v1350_v1 = vsel %vm970_vm8, %v1349_v30, %v1348_v34 }
 0x2ad   : > { %v1169_v52 = vpop.xlane.xlu1 %1168  ;;  %1382 = vst [vmem:[%s2344_s17] sm:$0xff] %v1350_v1 }
 0x2ae   : > { %v1172_v6 = vmul.f32 0.0078125, %v1169_v52 }
 0x2b0   : > { %v1175_v5 = vadd.f32 1e-05, %v1172_v6 }
 0x2b2   : > { %1568 = vrsqrt.f32 %v1175_v5 }
 0x2b5   : > { %v1167_v11 = vpop.xlane.xlu0 %1166 }
 0x2b6   : > { %v1171_v13 = vmul.f32 0.0078125, %v1167_v11 }
 0x2b8   : > { %v1174_v44 = vadd.f32 1e-05, %v1171_v13 }
 0x2ba   : > { %1570 = vrsqrt.f32 %v1174_v44 }
 0x2bc   : > { %v1569_v16 = vpop.eup %1568 }
 0x2bd   : > { %v1196_v19 = vrot.slane %v1569_v16, 1  ;;  %v1197_v22 = vrot.slane %v1569_v16, 2  ;;  %v1198_v17 = vrot.slane %v1569_v16, 3  ;;  %v1199_v50 = vrot.slane %v1569_v16, 4 }
 0x2be   : > { %v1200_v36 = vrot.slane %v1569_v16, 5  ;;  %v1201_v60 = vrot.slane %v1569_v16, 6  ;;  %v1202_v41 = vrot.slane %v1569_v16, 7  ;;  %v1243_v29 = vmul.f32 %v1569_v16, %v2207_v35 }
 0x2bf   : > { %v1244_v33 = vmul.f32 %v1196_v19, %v2210_v54  ;;  %v1245_v42 = vmul.f32 %v1197_v22, %v2213_v37  ;;  %v1246_v38 = vmul.f32 %v1198_v17, %v2216_v55  ;;  %v1247_v62 = vmul.f32 %v1199_v50, %v2219_v56 }
 0x2c0   : > { %v1248_v45 = vmul.f32 %v1200_v36, %v2222_v57  ;;  %v1249_v48 = vmul.f32 %v1201_v60, %v2225_v43  ;;  %v1250_v47 = vmul.f32 %v1202_v41, %v2228_v4  ;;  %v1274_v58 = vmul.f32 %v2303_v23, %v1243_v29 }
 0x2c1   : > { %v1275_v0 = vmul.f32 %v2303_v23, %v1244_v33  ;;  %v1276_v35 = vmul.f32 %v2303_v23, %v1245_v42  ;;  %v1277_v54 = vmul.f32 %v2303_v23, %v1246_v38  ;;  %v1278_v37 = vmul.f32 %v2303_v23, %v1247_v62 }
 0x2c2   : > { %v1279_v55 = vmul.f32 %v2303_v23, %v1248_v45  ;;  %v1280_v57 = vmul.f32 %v2303_v23, %v1249_v48  ;;  %v1281_v43 = vmul.f32 %v2303_v23, %v1250_v47  ;;  %v1305_v4 = vadd.f32 %v2323_v49, %v1274_v58 }
 0x2c3   : > { %v1306_v56 = vadd.f32 %v2323_v49, %v1275_v0  ;;  %v1307_v59 = vadd.f32 %v2323_v49, %v1276_v35  ;;  %v1308_v39 = vadd.f32 %v2323_v49, %v1277_v54  ;;  %v1309_v8 = vadd.f32 %v2323_v49, %v1278_v37 }
 0x2c4   : > { %v1571_v40 = vpop.eup %1570  ;;  %v1310_v32 = vadd.f32 %v2323_v49, %v1279_v55  ;;  %v1311_v11 = vadd.f32 %v2323_v49, %v1280_v57  ;;  %v1312_v44 = vadd.f32 %v2323_v49, %v1281_v43 }
 0x2c5   : > { %v1365_v51 = vrot.slane %v1306_v56, 7  ;;  %v1189_v12 = vrot.slane %v1571_v40, 1  ;;  %v1190_v53 = vrot.slane %v1571_v40, 2  ;;  %v1191_v46 = vrot.slane %v1571_v40, 3 }
 0x2c6   : > { %v1192_v63 = vrot.slane %v1571_v40, 4  ;;  %v1193_v2 = vrot.slane %v1571_v40, 5  ;;  %v1194_v10 = vrot.slane %v1571_v40, 6  ;;  %v1195_v15 = vrot.slane %v1571_v40, 7 }
 0x2c7   : > { %v1235_v18 = vmul.f32 %v1571_v40, %v2250_v20  ;;  %v1236_v7 = vmul.f32 %v1189_v12, %v2253_v9  ;;  %v1237_v3 = vmul.f32 %v1190_v53, %v2256_v26  ;;  %v1238_v24 = vmul.f32 %v1191_v46, %v2260_v28 }
 0x2c8   : > { %v1239_v21 = vmul.f32 %v1192_v63, %v2263_v25  ;;  %v1240_v61 = vmul.f32 %v1193_v2, %v2266_v31  ;;  %v1241_v30 = vmul.f32 %v1194_v10, %v2270_v27  ;;  %v1242_v34 = vmul.f32 %v1195_v15, %v2273_v14 }
 0x2c9   : > { %v1266_v52 = vmul.f32 %v2303_v23, %v1235_v18  ;;  %v1267_v1 = vmul.f32 %v2303_v23, %v1236_v7  ;;  %v1268_v20 = vmul.f32 %v2303_v23, %v1237_v3  ;;  %v1269_v9 = vmul.f32 %v2303_v23, %v1238_v24 }
 0x2ca   : > { %v1270_v26 = vmul.f32 %v2303_v23, %v1239_v21  ;;  %v1271_v28 = vmul.f32 %v2303_v23, %v1240_v61  ;;  %v1272_v25 = vmul.f32 %v2303_v23, %v1241_v30  ;;  %v1273_v31 = vmul.f32 %v2303_v23, %v1242_v34 }
 0x2cb   : > { %v1367_v6 = vrot.slane %v1307_v59, 6  ;;  %v1298_v27 = vadd.f32 %v2323_v49, %v1267_v1  ;;  %v1299_v14 = vadd.f32 %v2323_v49, %v1268_v20  ;;  %v1300_v5 = vadd.f32 %v2323_v49, %v1269_v9 }
 0x2cc   : > { %v1301_v13 = vadd.f32 %v2323_v49, %v1270_v26  ;;  %v1366_v16 = vsel %vm958_vm2, %v1365_v51, %v1305_v4  ;;  %v1369_v19 = vrot.slane %v1308_v39, 5  ;;  %v1297_v22 = vadd.f32 %v2323_v49, %v1266_v52 }
 0x2cd   : > { %v1302_v23 = vadd.f32 %v2323_v49, %v1271_v28  ;;  %v1351_v17 = vrot.slane %v1298_v27, 7  ;;  %v1353_v50 = vrot.slane %v1299_v14, 6  ;;  %v1303_v36 = vadd.f32 %v2323_v49, %v1272_v25 }
 0x2ce   : > { %v1304_v60 = vadd.f32 %v2323_v49, %v1273_v31  ;;  %v1368_v41 = vsel %vm960_vm3, %v1367_v6, %v1366_v16  ;;  %v1371_v29 = vrot.slane %v1309_v8, 4  ;;  %v1355_v42 = vrot.slane %v1300_v5, 5 }
 0x2cf   : > { %v1352_v33 = vsel %vm958_vm2, %v1351_v17, %v1297_v22  ;;  %v1370_v38 = vsel %vm962_vm4, %v1369_v19, %v1368_v41  ;;  %v1373_v62 = vrot.slane %v1310_v32, 3  ;;  %v1357_v48 = vrot.slane %v1301_v13, 4 }
 0x2d0   : > { %v1354_v45 = vsel %vm960_vm3, %v1353_v50, %v1352_v33  ;;  %v1372_v47 = vsel %vm964_vm5, %v1371_v29, %v1370_v38  ;;  %v1375_v58 = vrot.slane %v1311_v11, 2  ;;  %v1359_v0 = vrot.slane %v1302_v23, 3 }
 0x2d1   : > { %v1356_v49 = vsel %vm962_vm4, %v1355_v42, %v1354_v45  ;;  %v1374_v35 = vsel %vm966_vm6, %v1373_v62, %v1372_v47  ;;  %v1377_v54 = vrot.slane %v1312_v44, 1  ;;  %v1361_v55 = vrot.slane %v1303_v36, 2 }
 0x2d2   : > { %v1358_v37 = vsel %vm964_vm5, %v1357_v48, %v1356_v49  ;;  %v1376_v56 = vsel %vm968_vm7, %v1375_v58, %v1374_v35  ;;  %v1363_v43 = vrot.slane %v1304_v60, 1 }
 0x2d3   : > { %v1360_v57 = vsel %vm966_vm6, %v1359_v0, %v1358_v37  ;;  %v1378_v4 = vsel %vm970_vm8, %v1377_v54, %v1376_v56 }
 0x2d4   : > { %v1362_v59 = vsel %vm968_vm7, %v1361_v55, %v1360_v57  ;;  %1384 = vst [vmem:[%s2344_s17 + $0x10] sm:$0xff] %v1378_v4 }
 0x2d5   : > { %v1364_v40 = vsel %vm970_vm8, %v1363_v43, %v1362_v59 }
 0x2d6   : > { %1383 = vst [vmem:[%s2344_s17 + $0x8] sm:$0xff] %v1364_v40 }
 0x2d7   : > { %1585 = shalt.err (!%p1582_p3)
}
 0x2d8   : > { %s1586_s9 = scalar_lea.hbm %s2412_s30, 384  ;;  %s1590_s14 = scalar_lea.hbm %s2468_s5, 768 }
 0x2d9   : > { %p1587_p4 = scmp.ne.s32.totalorder %s2412_s30, %s1586_s9  ;;  %p1591_p9 = scmp.lt.u32.totalorder %s2412_s30, %s2468_s5 }
 0x2da   : > { %p1592_p10 = scmp.lt.u32.totalorder %s1590_s14, %s1586_s9  ;;  %p1594_p12 = scmp.lt.u32.totalorder %s1586_s9, %s2412_s30 }
 0x2db   : > { %p1588_p7 = pnand %p1587_p4, %p1708_p5 }
 0x2dc   : > { %p1593_p11 = por %p1592_p10, %p1591_p9 }
 0x2dd   : > { %p1589_p8 = pneg %p1588_p7 }
 0x2de   : > { %p1595_p13 = por %p1594_p12, %p1593_p11 }
 0x2e0   : > { %p1596_p0 = pnand %p1595_p13, %p1589_p8 }
 0x2e2   : > { %1599 = shalt.err (!%p1596_p0)
}
 0x2e3   : > { %s1638_s17 = smov 128   ;;  %s1639_s23 = smov 8  }
 0x2e4   : > { %1524 = dma.vmem_to_hbm [thread:$0]  (%p1708_p5), %s2416_s25, 384, %s2412_s30, %s2422_s6, %s1638_s17, %s1638_s17, %s1639_s23  }
 0x2e5 PF: > { %p1530_p1 = scmp.ge.s32.totalorder %s1634_s21, 2  ;;  %s1414_s22 = sand.u32 1, %s1622_s18  }
 0x2e6   : > { %s1415_s26 = scalar_lea.sflag [#allocation3], %s1414_s22 }
 0x2e7   : > { %p1527_p2 = pnand %p1530_p1, %p1712_p6 }
 0x2e9   : > { %1617 = dma.done.wait (!%p1527_p2), %s1415_s26, 384  }
 0x2ea   : > { %1619 = vsyncadd (!%p1527_p2), %s1415_s26, 4294966912  ;;  %p15_p3 = scmp.ge.s32.totalorder %s1695_s24, 4   ;;  %s2471_s18 = smov %s1626_s19 }
 0x2eb   : > { %s2472_s19 = smov %s1630_s20  ;;  %s2473_s20 = smov %s1706_s27 }
 0x2ec   : > { %s2474_s21 = smov %s1695_s24  ;;  %17 = sbr.rel (!%p15_p3) target bundleno = 3 (0x3), region = 75 }
 0x2f3   :  { %1420 = vsyncpa [#allocation3], 1 }
 0x2f4   :  { %1422 = vsyncpa [#allocation3 + $0x1], 1 }

</bundles_post_ra>
